<compile_context>
chip_gen: v5e
topology: v5e:2x2
jax: 0.10.0
libtpu: 0.0.40
codegen_flags: <defaults>
</compile_context>

<pallas_src>
import functools
import math

import jax
import jax.numpy as jnp
from jax import lax
from jax.experimental import pallas as pl
from jax.experimental.pallas import tpu as pltpu

# ---------------- config ----------------
VOCAB = 256
MAX_POS = 64
TYPE_VOCAB = 2
HIDDEN = 128
NUM_HEADS = 4
HEAD_DIM = HIDDEN // NUM_HEADS
INTERMEDIATE = 4 * HIDDEN
NUM_LAYERS = 2
NUM_CLASSES = 4
CLASSES_PAD = 128          # lane-dense classifier output; sliced to NUM_CLASSES in JAX
LN_EPS = 1e-12
NEG_INF = -1e9


def _gelu(x):
    # tanh-approx GELU (HF BERT uses erf-GELU; tanh form for reliable TPU EUP lowering)
    # TODO(synk): exact erf-GELU to match HF numerics bit-for-bit.
    return 0.5 * x * (1.0 + jnp.tanh(0.7978845608028654 * (x + 0.044715 * x * x * x)))


def _layernorm_f32(y, gamma, beta):
    mean = jnp.mean(y, axis=-1, keepdims=True)
    var = jnp.mean((y - mean) * (y - mean), axis=-1, keepdims=True)
    inv = lax.rsqrt(var + LN_EPS)
    return (y - mean) * inv * gamma + beta


# ---------------- fused encoder-stack kernel ----------------
def _encoder_kernel(lens_ref,                                   # scalar prefetch (SMEM)
                    emb_ref, eg_ref, eb_ref,                    # embeddings + emb LN
                    wqkv_ref, bqkv_ref, wo_ref, bo_ref, g1_ref, t1_ref,
                    w1_ref, c1_ref, w2_ref, c2_ref, g2_ref, t2_ref,
                    out_ref, *, scale):
    """One grid step = (one batch element, one transformer layer).

    The residual stream is carried in out_ref's VMEM block (its index depends only
    on the batch axis, so it stays resident across the sequential layer axis).
    """
    b = pl.program_id(0)
    l = pl.program_id(1)
    seq = out_ref.shape[1]

    # Layer 0: fuse the embedding LayerNorm and seed the residual stream.
    @pl.when(l == 0)
    def _():
        e = emb_ref[0].astype(jnp.float32)
        out_ref[0] = _layernorm_f32(e, eg_ref[...], eb_ref[...]).astype(out_ref.dtype)

    x = out_ref[0]                                               # (S, H) bf16 residual

    # Additive attention mask generated in-kernel from per-batch valid length.
    vlen = lens_ref[b]
    key_pos = lax.broadcasted_iota(jnp.int32, (1, seq), 1)
    mask = jnp.where(key_pos < vlen, 0.0, NEG_INF).astype(jnp.float32)      # (1, S)

    # ---- attention: fused QKV proj + per-head attn + single out-proj + LN ----
    qkv = jnp.dot(x, wqkv_ref[0], preferred_element_type=jnp.float32)
    qkv = (qkv + bqkv_ref[0]).astype(jnp.bfloat16)               # (S, 3H) bf16, one cast

    ctx_heads = []
    # TODO(synk): at real scale (12 heads, S=512) switch to lax.fori_loop with a VMEM
    # scratch accumulator to bound live ranges.
    for h in range(NUM_HEADS):
        lo = h * HEAD_DIM
        q = qkv[:, lo:lo + HEAD_DIM]                                         # (S, Dh)
        k = qkv[:, HIDDEN + lo:HIDDEN + lo + HEAD_DIM]
        v = qkv[:, 2 * HIDDEN + lo:2 * HIDDEN + lo + HEAD_DIM]
        # scores: contract last dims directly (no materialized K^T)
        s = lax.dot_general(q, k, (((1,), (1,)), ((), ())),
                            preferred_element_type=jnp.float32) * scale      # (S, S)
        s = s + mask
        s = s - jnp.max(s, axis=-1, keepdims=True)
        p = jnp.exp(s)
        p = p * pl.reciprocal(jnp.sum(p, axis=-1, keepdims=True), approx=True)
        ctx_heads.append(jnp.dot(p.astype(jnp.bfloat16), v,
                                 preferred_element_type=jnp.float32))        # (S, Dh)
    ctx = jnp.concatenate(ctx_heads, axis=-1).astype(jnp.bfloat16)           # (S, H)

    y = jnp.dot(ctx, wo_ref[0], preferred_element_type=jnp.float32)          # K=128 matmul
    y = y + bo_ref[0] + x.astype(jnp.float32)                    # bias + residual
    x1 = _layernorm_f32(y, g1_ref[0], t1_ref[0])                 # f32 (S, H)
    x1_bf = x1.astype(jnp.bfloat16)

    # ---- FFN: W1 + bias + GELU + W2 + bias + residual + LN (all in VMEM) ----
    h1 = jnp.dot(x1_bf, w1_ref[0], preferred_element_type=jnp.float32) + c1_ref[0]
    h1 = _gelu(h1)                                               # f32 (S, I)
    y2 = jnp.dot(h1.astype(jnp.bfloat16), w2_ref[0],
                 preferred_element_type=jnp.float32) + c2_ref[0]
    y2 = y2 + x1
    out_ref[0] = _layernorm_f32(y2, g2_ref[0], t2_ref[0]).astype(out_ref.dtype)


def encoder(emb, lens, emb_g, emb_b, lp):
    """Whole encoder stack in one pallas_call with cross-layer weight prefetch."""
    B, S, H = emb.shape
    I = INTERMEDIATE
    kernel = functools.partial(_encoder_kernel, scale=1.0 / math.sqrt(HEAD_DIM))

    const = lambda b, l, lens: (0, 0)              # emb LN params (2-D)
    per_batch = lambda b, l, lens: (b, 0, 0)       # activations / output
    per_layer = lambda b, l, lens: (l, 0, 0)       # stacked layer weights

    return pl.pallas_call(
        kernel,
        out_shape=jax.ShapeDtypeStruct((B, S, H), jnp.bfloat16),
        grid_spec=pltpu.PrefetchScalarGridSpec(
            num_scalar_prefetch=1,
            grid=(B, NUM_LAYERS),
            in_specs=[
                pl.BlockSpec((1, S, H), per_batch),          # embeddings (read at l==0)
                pl.BlockSpec((1, H), const),                 # emb LN gamma
                pl.BlockSpec((1, H), const),                 # emb LN beta
                pl.BlockSpec((1, H, 3 * H), per_layer),      # fused Q|K|V weight
                pl.BlockSpec((1, 1, 3 * H), per_layer),      # fused Q|K|V bias
                pl.BlockSpec((1, H, H), per_layer),          # attn out-proj weight
                pl.BlockSpec((1, 1, H), per_layer),          # attn out-proj bias
                pl.BlockSpec((1, 1, H), per_layer),          # LN1 gamma
                pl.BlockSpec((1, 1, H), per_layer),          # LN1 beta
                pl.BlockSpec((1, H, I), per_layer),          # FFN w1
                pl.BlockSpec((1, 1, I), per_layer),          # FFN b1
                pl.BlockSpec((1, I, H), per_layer),          # FFN w2
                pl.BlockSpec((1, 1, H), per_layer),          # FFN b2
                pl.BlockSpec((1, 1, H), per_layer),          # LN2 gamma
                pl.BlockSpec((1, 1, H), per_layer),          # LN2 beta
            ],
            out_specs=pl.BlockSpec((1, S, H), per_batch),
        ),
        compiler_params=pltpu.CompilerParams(
            dimension_semantics=("parallel", "arbitrary"),
            vmem_limit_bytes=32 * 1024 * 1024,
        ),
    )(lens, emb, emb_g.reshape(1, H), emb_b.reshape(1, H),
      lp["wqkv"], lp["bqkv"], lp["wo"], lp["bo"], lp["ln1_g"], lp["ln1_b"],
      lp["w1"], lp["b1"], lp["w2"], lp["b2"], lp["ln2_g"], lp["ln2_b"])


# ---------------- fused pooler + classifier head ----------------
def _head_kernel(x_ref, pw_ref, pb_ref, ow_ref, ob_ref, o_ref):
    """BERT pooler (tanh(W_p h_cls + b_p)) + classifier Linear, 128-lane output."""
    pooled = jnp.dot(x_ref[...], pw_ref[...], preferred_element_type=jnp.float32)
    pooled = jnp.tanh(pooled + pb_ref[...])
    o_ref[...] = (jnp.dot(pooled.astype(jnp.bfloat16), ow_ref[...],
                          preferred_element_type=jnp.float32) + ob_ref[...])


def pooler_classifier(cls_pad, pool_w, pool_b, out_w_pad, out_b_pad):
    Mp, H = cls_pad.shape
    return pl.pallas_call(
        _head_kernel,
        out_shape=jax.ShapeDtypeStruct((Mp, CLASSES_PAD), jnp.float32),
        grid=(1,),
        in_specs=[
            pl.BlockSpec((Mp, H), lambda i: (0, 0)),
            pl.BlockSpec((H, H), lambda i: (0, 0)),
            pl.BlockSpec((1, H), lambda i: (0, 0)),
            pl.BlockSpec((H, CLASSES_PAD), lambda i: (0, 0)),
            pl.BlockSpec((1, CLASSES_PAD), lambda i: (0, 0)),
        ],
        out_specs=pl.BlockSpec((Mp, CLASSES_PAD), lambda i: (0, 0)),
    )(cls_pad, pool_w, pool_b.reshape(1, H), out_w_pad, out_b_pad.reshape(1, CLASSES_PAD))


# ---------------- parameters ----------------
def init_params(key):
    cnt = [0]

    def nk():
        cnt[0] += 1
        return jax.random.fold_in(key, cnt[0])

    def normal(shape, dtype=jnp.bfloat16):
        return (0.02 * jax.random.normal(nk(), shape, dtype=jnp.float32)).astype(dtype)

    def zeros(shape):
        return jnp.zeros(shape, jnp.float32)

    def ones(shape):
        return jnp.ones(shape, jnp.float32)

    L, H, I = NUM_LAYERS, HIDDEN, INTERMEDIATE
    p = {
        "word_emb": normal((VOCAB, H), jnp.float32),
        "pos_emb": normal((MAX_POS, H), jnp.float32),
        "type_emb": normal((TYPE_VOCAB, H), jnp.float32),
        "emb_ln_g": ones((H,)),
        "emb_ln_b": zeros((H,)),
        # per-layer weights stacked along a leading layer axis for prefetch pipelining
        "layers": {
            "wqkv": normal((L, H, 3 * H)), "bqkv": zeros((L, 1, 3 * H)),
            "wo": normal((L, H, H)), "bo": zeros((L, 1, H)),
            "ln1_g": ones((L, 1, H)), "ln1_b": zeros((L, 1, H)),
            "w1": normal((L, H, I)), "b1": zeros((L, 1, I)),
            "w2": normal((L, I, H)), "b2": zeros((L, 1, H)),
            "ln2_g": ones((L, 1, H)), "ln2_b": zeros((L, 1, H)),
        },
        "pool_w": normal((H, H)),
        "pool_b": zeros((H,)),
        # nn.Linear(hidden, 4) classifier head, zero-padded to 128 output lanes
        "out_w": jnp.zeros((H, CLASSES_PAD), jnp.bfloat16)
                   .at[:, :NUM_CLASSES].set(normal((H, NUM_CLASSES))),
        "out_b": zeros((CLASSES_PAD,)),
    }
    return p


# ---------------- forward ----------------
def bert_forward(p, ids, mask, token_type_ids):
    B, S = ids.shape
    # embedding gather is glue (plain JAX); LayerNorm is fused into the encoder kernel
    pos = jnp.arange(S, dtype=jnp.int32)[None, :]
    emb = (jnp.take(p["word_emb"], ids, axis=0)
           + jnp.take(p["pos_emb"], pos, axis=0)
           + jnp.take(p["type_emb"], token_type_ids, axis=0)).astype(jnp.bfloat16)

    # Per-batch valid length (prefix-padding attention mask), consumed via scalar prefetch.
    # TODO(synk): arbitrary (non-prefix) attention masks would need the full mask streamed.
    lens = jnp.sum(mask.astype(jnp.int32), axis=-1).astype(jnp.int32)        # (B,)

    h = encoder(emb, lens, p["emb_ln_g"], p["emb_ln_b"], p["layers"])        # (B,S,H) bf16

    # BERT pooler on the [CLS] token, fused with the classifier head.
    cls = h[:, 0, :]
    rows_pad = max(8, ((B + 7) // 8) * 8)                        # full sublane tile
    cls_pad = jnp.zeros((rows_pad, HIDDEN), jnp.bfloat16).at[:B].set(cls)

    # nn.Dropout(0.5) is identity at inference time.
    # TODO(synk): training-mode dropout (random mask) not implemented.
    logits_pad = pooler_classifier(cls_pad, p["pool_w"], p["pool_b"],
                                   p["out_w"], p["out_b"])
    return logits_pad[:B, :NUM_CLASSES]


# ---------------- main ----------------
if __name__ == "__main__":
    key = jax.random.PRNGKey(0)
    pkey, ikey = jax.random.split(key)
    params = init_params(pkey)

    B, S = 2, 16
    ids = jax.random.randint(ikey, (B, S), 0, VOCAB, dtype=jnp.int32)
    mask = jnp.ones((B, S), dtype=jnp.int32).at[:, S - 4:].set(0)   # last 4 tokens padded
    token_type_ids = jnp.zeros((B, S), dtype=jnp.int32)

    fwd = jax.jit(bert_forward)
    logits = fwd(params, ids, mask, token_type_ids)
    jax.block_until_ready(logits)
    assert logits.shape == (B, NUM_CLASSES)
    assert bool(jnp.all(jnp.isfinite(logits)))
    print("KERNEL_OK")
</pallas_src>

<mosaic_0001>
module attributes {stable_mosaic.version = 11 : i64} {
  func.func @_head_kernel(%arg0: i32, %arg1: memref<8x128xbf16, #tpu.memory_space<vmem>>, %arg2: memref<128x128xbf16, #tpu.memory_space<vmem>>, %arg3: memref<1x128xf32, #tpu.memory_space<vmem>>, %arg4: memref<128x128xbf16, #tpu.memory_space<vmem>>, %arg5: memref<1x128xf32, #tpu.memory_space<vmem>>, %arg6: memref<8x128xf32, #tpu.memory_space<vmem>>) attributes {dimension_semantics = [#tpu.dimension_semantics<arbitrary>], iteration_bounds = array<i64: 1>, scalar_prefetch = 0 : i64, scratch_operands = 0 : i64, tpu.core_type = #tpu.core_type<tc>, window_params = [{pipeline_mode = #tpu.pipeline_mode<synchronous>, transform_indices = @transform_0, window_bounds = array<i64: 8, 128>}, {pipeline_mode = #tpu.pipeline_mode<synchronous>, transform_indices = @transform_1, window_bounds = array<i64: 128, 128>}, {pipeline_mode = #tpu.pipeline_mode<synchronous>, transform_indices = @transform_2, window_bounds = array<i64: 1, 128>}, {pipeline_mode = #tpu.pipeline_mode<synchronous>, transform_indices = @transform_3, window_bounds = array<i64: 128, 128>}, {pipeline_mode = #tpu.pipeline_mode<synchronous>, transform_indices = @transform_4, window_bounds = array<i64: 1, 128>}, {pipeline_mode = #tpu.pipeline_mode<synchronous>, transform_indices = @transform_5, window_bounds = array<i64: 8, 128>}]} {
    %c0 = arith.constant 0 : index
    %c0_0 = arith.constant 0 : index
    %0 = vector.load %arg1[%c0, %c0_0] : memref<8x128xbf16, #tpu.memory_space<vmem>>, vector<8x128xbf16>
    %c0_1 = arith.constant 0 : index
    %c0_2 = arith.constant 0 : index
    %1 = vector.load %arg2[%c0_1, %c0_2] : memref<128x128xbf16, #tpu.memory_space<vmem>>, vector<128x128xbf16>
    %cst = arith.constant dense<0.000000e+00> : vector<8x128xf32>
    %2 = tpu.matmul %0, %1, %cst {dimension_numbers = #tpu.dot_dimension_numbers<[1], [0], [0], [1], [0, 0, 1, 1], [], []>} : vector<8x128xbf16>, vector<128x128xbf16>, vector<8x128xf32> -> vector<8x128xf32>
    %c0_3 = arith.constant 0 : index
    %c0_4 = arith.constant 0 : index
    %3 = vector.load %arg3[%c0_3, %c0_4] : memref<1x128xf32, #tpu.memory_space<vmem>>, vector<1x128xf32>
    %4 = vector.broadcast %3 : vector<1x128xf32> to vector<8x128xf32>
    %5 = arith.addf %2, %4 : vector<8x128xf32>
    %6 = math.tanh %5 : vector<8x128xf32>
    %7 = arith.truncf %6 : vector<8x128xf32> to vector<8x128xbf16>
    %c0_5 = arith.constant 0 : index
    %c0_6 = arith.constant 0 : index
    %8 = vector.load %arg4[%c0_5, %c0_6] : memref<128x128xbf16, #tpu.memory_space<vmem>>, vector<128x128xbf16>
    %cst_7 = arith.constant dense<0.000000e+00> : vector<8x128xf32>
    %9 = tpu.matmul %7, %8, %cst_7 {dimension_numbers = #tpu.dot_dimension_numbers<[1], [0], [0], [1], [0, 0, 1, 1], [], []>} : vector<8x128xbf16>, vector<128x128xbf16>, vector<8x128xf32> -> vector<8x128xf32>
    %c0_8 = arith.constant 0 : index
    %c0_9 = arith.constant 0 : index
    %10 = vector.load %arg5[%c0_8, %c0_9] : memref<1x128xf32, #tpu.memory_space<vmem>>, vector<1x128xf32>
    %11 = vector.broadcast %10 : vector<1x128xf32> to vector<8x128xf32>
    %12 = arith.addf %9, %11 : vector<8x128xf32>
    %c0_10 = arith.constant 0 : index
    %c0_11 = arith.constant 0 : index
    %13 = vector.load %arg6[%c0_10, %c0_11] : memref<8x128xf32, #tpu.memory_space<vmem>>, vector<8x128xf32>
    tpu.vector_store %arg6[%c0_10, %c0_11], %12 {strides = array<i32>} : memref<8x128xf32, #tpu.memory_space<vmem>>, vector<8x128xf32>,
    return
  }
  func.func @transform_0(%arg0: i32) -> (i32, i32) {
    %c0_i32 = arith.constant 0 : i32
    %c0_i32_0 = arith.constant 0 : i32
    %c0_i32_1 = arith.constant 0 : i32
    return %c0_i32, %c0_i32_0 : i32, i32
  }
  func.func @transform_1(%arg0: i32) -> (i32, i32) {
    %c0_i32 = arith.constant 0 : i32
    %c0_i32_0 = arith.constant 0 : i32
    %c0_i32_1 = arith.constant 0 : i32
    return %c0_i32, %c0_i32_0 : i32, i32
  }
  func.func @transform_2(%arg0: i32) -> (i32, i32) {
    %c0_i32 = arith.constant 0 : i32
    %c0_i32_0 = arith.constant 0 : i32
    %c0_i32_1 = arith.constant 0 : i32
    return %c0_i32, %c0_i32_0 : i32, i32
  }
  func.func @transform_3(%arg0: i32) -> (i32, i32) {
    %c0_i32 = arith.constant 0 : i32
    %c0_i32_0 = arith.constant 0 : i32
    %c0_i32_1 = arith.constant 0 : i32
    return %c0_i32, %c0_i32_0 : i32, i32
  }
  func.func @transform_4(%arg0: i32) -> (i32, i32) {
    %c0_i32 = arith.constant 0 : i32
    %c0_i32_0 = arith.constant 0 : i32
    %c0_i32_1 = arith.constant 0 : i32
    return %c0_i32, %c0_i32_0 : i32, i32
  }
  func.func @transform_5(%arg0: i32) -> (i32, i32) {
    %c0_i32 = arith.constant 0 : i32
    %c0_i32_0 = arith.constant 0 : i32
    %c0_i32_1 = arith.constant 0 : i32
    return %c0_i32, %c0_i32_0 : i32, i32
  }
}

module attributes {stable_mosaic.version = 11 : i64} {
  func.func @_encoder_kernel(%arg0: i32, %arg1: i32, %arg2: memref<2xi32, #tpu.memory_space<smem>>, %arg3: memref<1x16x128xbf16, #tpu.memory_space<vmem>>, %arg4: memref<1x128xf32, #tpu.memory_space<vmem>>, %arg5: memref<1x128xf32, #tpu.memory_space<vmem>>, %arg6: memref<1x128x384xbf16, #tpu.memory_space<vmem>>, %arg7: memref<1x1x384xf32, #tpu.memory_space<vmem>>, %arg8: memref<1x128x128xbf16, #tpu.memory_space<vmem>>, %arg9: memref<1x1x128xf32, #tpu.memory_space<vmem>>, %arg10: memref<1x1x128xf32, #tpu.memory_space<vmem>>, %arg11: memref<1x1x128xf32, #tpu.memory_space<vmem>>, %arg12: memref<1x128x512xbf16, #tpu.memory_space<vmem>>, %arg13: memref<1x1x512xf32, #tpu.memory_space<vmem>>, %arg14: memref<1x512x128xbf16, #tpu.memory_space<vmem>>, %arg15: memref<1x1x128xf32, #tpu.memory_space<vmem>>, %arg16: memref<1x1x128xf32, #tpu.memory_space<vmem>>, %arg17: memref<1x1x128xf32, #tpu.memory_space<vmem>>, %arg18: memref<1x16x128xbf16, #tpu.memory_space<vmem>>) attributes {dimension_semantics = [#tpu.dimension_semantics<parallel>, #tpu.dimension_semantics<arbitrary>], iteration_bounds = array<i64: 2, 2>, scalar_prefetch = 1 : i64, scratch_operands = 0 : i64, tpu.core_type = #tpu.core_type<tc>, window_params = [{transform_indices = @transform_0, window_bounds = array<i64: 1, 16, 128>}, {pipeline_mode = #tpu.pipeline_mode<synchronous>, transform_indices = @transform_1, window_bounds = array<i64: 1, 128>}, {pipeline_mode = #tpu.pipeline_mode<synchronous>, transform_indices = @transform_2, window_bounds = array<i64: 1, 128>}, {transform_indices = @transform_3, window_bounds = array<i64: 1, 128, 384>}, {transform_indices = @transform_4, window_bounds = array<i64: 1, 1, 384>}, {transform_indices = @transform_5, window_bounds = array<i64: 1, 128, 128>}, {transform_indices = @transform_6, window_bounds = array<i64: 1, 1, 128>}, {transform_indices = @transform_7, window_bounds = array<i64: 1, 1, 128>}, {transform_indices = @transform_8, window_bounds = array<i64: 1, 1, 128>}, {transform_indices = @transform_9, window_bounds = array<i64: 1, 128, 512>}, {transform_indices = @transform_10, window_bounds = array<i64: 1, 1, 512>}, {transform_indices = @transform_11, window_bounds = array<i64: 1, 512, 128>}, {transform_indices = @transform_12, window_bounds = array<i64: 1, 1, 128>}, {transform_indices = @transform_13, window_bounds = array<i64: 1, 1, 128>}, {transform_indices = @transform_14, window_bounds = array<i64: 1, 1, 128>}, {transform_indices = @transform_15, window_bounds = array<i64: 1, 16, 128>}]} {
    %c0_i32 = arith.constant 0 : i32
    %0 = arith.cmpi eq, %arg1, %c0_i32 : i32
    %1 = arith.extui %0 : i1 to i32
    %c0_i32_0 = arith.constant 0 : i32
    %2 = arith.cmpi ne, %1, %c0_i32_0 : i32
    scf.if %2 {
      %c0_81 = arith.constant 0 : index
      %c0_82 = arith.constant 0 : index
      %c0_83 = arith.constant 0 : index
      %202 = vector.load %arg3[%c0_81, %c0_82, %c0_83] : memref<1x16x128xbf16, #tpu.memory_space<vmem>>, vector<1x16x128xbf16>
      %203 = vector.shape_cast %202 : vector<1x16x128xbf16> to vector<16x128xbf16>
      %204 = arith.extf %203 : vector<16x128xbf16> to vector<16x128xf32>
      %c0_84 = arith.constant 0 : index
      %c0_85 = arith.constant 0 : index
      %205 = vector.load %arg4[%c0_84, %c0_85] : memref<1x128xf32, #tpu.memory_space<vmem>>, vector<1x128xf32>
      %c0_86 = arith.constant 0 : index
      %c0_87 = arith.constant 0 : index
      %206 = vector.load %arg5[%c0_86, %c0_87] : memref<1x128xf32, #tpu.memory_space<vmem>>, vector<1x128xf32>
      %cst_88 = arith.constant dense<0.000000e+00> : vector<16xf32>
      %207 = vector.multi_reduction <add>, %204, %cst_88 [1] : vector<16x128xf32> to vector<16xf32>
      %208 = vector.shape_cast %207 : vector<16xf32> to vector<16x1xf32>
      %cst_89 = arith.constant 1.280000e+02 : f32
      %209 = vector.broadcast %cst_89 : f32 to vector<16x1xf32>
      %210 = arith.divf %208, %209 : vector<16x1xf32>
      %211 = vector.broadcast %210 : vector<16x1xf32> to vector<16x128xf32>
      %212 = arith.subf %204, %211 : vector<16x128xf32>
      %213 = vector.broadcast %210 : vector<16x1xf32> to vector<16x128xf32>
      %214 = arith.subf %204, %213 : vector<16x128xf32>
      %215 = arith.mulf %212, %214 : vector<16x128xf32>
      %cst_90 = arith.constant dense<0.000000e+00> : vector<16xf32>
      %216 = vector.multi_reduction <add>, %215, %cst_90 [1] : vector<16x128xf32> to vector<16xf32>
      %217 = vector.shape_cast %216 : vector<16xf32> to vector<16x1xf32>
      %cst_91 = arith.constant 1.280000e+02 : f32
      %218 = vector.broadcast %cst_91 : f32 to vector<16x1xf32>
      %219 = arith.divf %217, %218 : vector<16x1xf32>
      %cst_92 = arith.constant 9.99999996E-13 : f32
      %220 = vector.broadcast %cst_92 : f32 to vector<16x1xf32>
      %221 = arith.addf %219, %220 : vector<16x1xf32>
      %222 = math.rsqrt %221 : vector<16x1xf32>
      %223 = vector.broadcast %210 : vector<16x1xf32> to vector<16x128xf32>
      %224 = arith.subf %204, %223 : vector<16x128xf32>
      %225 = vector.broadcast %222 : vector<16x1xf32> to vector<16x128xf32>
      %226 = arith.mulf %224, %225 : vector<16x128xf32>
      %227 = vector.broadcast %205 : vector<1x128xf32> to vector<16x128xf32>
      %228 = arith.mulf %226, %227 : vector<16x128xf32>
      %229 = vector.broadcast %206 : vector<1x128xf32> to vector<16x128xf32>
      %230 = arith.addf %228, %229 : vector<16x128xf32>
      %231 = arith.truncf %230 : vector<16x128xf32> to vector<16x128xbf16>
      %c0_93 = arith.constant 0 : index
      %c0_94 = arith.constant 0 : index
      %c0_95 = arith.constant 0 : index
      %232 = vector.load %arg18[%c0_93, %c0_94, %c0_95] : memref<1x16x128xbf16, #tpu.memory_space<vmem>>, vector<1x16x128xbf16>
      %233 = vector.shape_cast %232 : vector<1x16x128xbf16> to vector<16x128xbf16>
      %234 = vector.shape_cast %231 : vector<16x128xbf16> to vector<1x16x128xbf16>
      tpu.vector_store %arg18[%c0_93, %c0_94, %c0_95], %234 {strides = array<i32>} : memref<1x16x128xbf16, #tpu.memory_space<vmem>>, vector<1x16x128xbf16>,
    } else {
    }
    %c0 = arith.constant 0 : index
    %c0_1 = arith.constant 0 : index
    %c0_2 = arith.constant 0 : index
    %3 = vector.load %arg18[%c0, %c0_1, %c0_2] : memref<1x16x128xbf16, #tpu.memory_space<vmem>>, vector<1x16x128xbf16>
    %4 = vector.shape_cast %3 : vector<1x16x128xbf16> to vector<16x128xbf16>
    %5 = arith.index_cast %arg0 : i32 to index
    %6 = memref.load %arg2[%5] : memref<2xi32, #tpu.memory_space<smem>>
    %7 = tpu.iota {dimensions = array<i32: 1>} : vector<1x16xi32>
    %8 = vector.broadcast %6 : i32 to vector<1x16xi32>
    %9 = arith.cmpi slt, %7, %8 : vector<1x16xi32>
    %cst = arith.constant 0.000000e+00 : f32
    %cst_3 = arith.constant -1.000000e+09 : f32
    %10 = vector.broadcast %cst : f32 to vector<1x16xf32>
    %11 = vector.broadcast %cst_3 : f32 to vector<1x16xf32>
    %12 = arith.select %9, %10, %11 : vector<1x16xi1>, vector<1x16xf32>
    %c0_4 = arith.constant 0 : index
    %c0_5 = arith.constant 0 : index
    %c0_6 = arith.constant 0 : index
    %13 = vector.load %arg6[%c0_4, %c0_5, %c0_6] : memref<1x128x384xbf16, #tpu.memory_space<vmem>>, vector<1x128x384xbf16>
    %14 = vector.shape_cast %13 : vector<1x128x384xbf16> to vector<128x384xbf16>
    %cst_7 = arith.constant dense<0.000000e+00> : vector<16x384xf32>
    %15 = tpu.matmul %4, %14, %cst_7 {dimension_numbers = #tpu.dot_dimension_numbers<[1], [0], [0], [1], [0, 0, 1, 1], [], []>} : vector<16x128xbf16>, vector<128x384xbf16>, vector<16x384xf32> -> vector<16x384xf32>
    %c0_8 = arith.constant 0 : index
    %c0_9 = arith.constant 0 : index
    %c0_10 = arith.constant 0 : index
    %16 = vector.load %arg7[%c0_8, %c0_9, %c0_10] : memref<1x1x384xf32, #tpu.memory_space<vmem>>, vector<1x1x384xf32>
    %17 = vector.shape_cast %16 : vector<1x1x384xf32> to vector<1x384xf32>
    %18 = vector.broadcast %17 : vector<1x384xf32> to vector<16x384xf32>
    %19 = arith.addf %15, %18 : vector<16x384xf32>
    %20 = arith.truncf %19 : vector<16x384xf32> to vector<16x384xbf16>
    %21 = vector.extract_strided_slice %20 {offsets = [0, 0], sizes = [16, 32], strides = [1, 1]} : vector<16x384xbf16> to vector<16x32xbf16>
    %22 = vector.extract_strided_slice %20 {offsets = [0, 128], sizes = [16, 32], strides = [1, 1]} : vector<16x384xbf16> to vector<16x32xbf16>
    %23 = vector.extract_strided_slice %20 {offsets = [0, 256], sizes = [16, 32], strides = [1, 1]} : vector<16x384xbf16> to vector<16x32xbf16>
    %cst_11 = arith.constant dense<0.000000e+00> : vector<16x16xf32>
    %24 = tpu.matmul %21, %22, %cst_11 {dimension_numbers = #tpu.dot_dimension_numbers<[1], [1], [0], [0], [0, 0, 1, 0], [], []>} : vector<16x32xbf16>, vector<16x32xbf16>, vector<16x16xf32> -> vector<16x16xf32>
    %cst_12 = arith.constant 0.176776692 : f32
    %25 = vector.broadcast %cst_12 : f32 to vector<16x16xf32>
    %26 = arith.mulf %24, %25 : vector<16x16xf32>
    %27 = vector.broadcast %12 : vector<1x16xf32> to vector<16x16xf32>
    %28 = arith.addf %26, %27 : vector<16x16xf32>
    %cst_13 = arith.constant dense<0xFF800000> : vector<16xf32>
    %29 = vector.multi_reduction <maximumf>, %28, %cst_13 [1] : vector<16x16xf32> to vector<16xf32>
    %30 = vector.shape_cast %29 : vector<16xf32> to vector<16x1xf32>
    %31 = vector.broadcast %30 : vector<16x1xf32> to vector<16x16xf32>
    %32 = arith.subf %28, %31 : vector<16x16xf32>
    %33 = math.exp %32 : vector<16x16xf32>
    %cst_14 = arith.constant dense<0.000000e+00> : vector<16xf32>
    %34 = vector.multi_reduction <add>, %33, %cst_14 [1] : vector<16x16xf32> to vector<16xf32>
    %35 = vector.shape_cast %34 : vector<16xf32> to vector<16x1xf32>
    %36 = tpu.reciprocal %35 {approx = true} : vector<16x1xf32> -> vector<16x1xf32>
    %37 = vector.broadcast %36 : vector<16x1xf32> to vector<16x16xf32>
    %38 = arith.mulf %33, %37 : vector<16x16xf32>
    %39 = arith.truncf %38 : vector<16x16xf32> to vector<16x16xbf16>
    %cst_15 = arith.constant dense<0.000000e+00> : vector<16x32xf32>
    %40 = tpu.matmul %39, %23, %cst_15 {dimension_numbers = #tpu.dot_dimension_numbers<[1], [0], [0], [1], [0, 0, 1, 1], [], []>} : vector<16x16xbf16>, vector<16x32xbf16>, vector<16x32xf32> -> vector<16x32xf32>
    %41 = vector.extract_strided_slice %20 {offsets = [0, 32], sizes = [16, 32], strides = [1, 1]} : vector<16x384xbf16> to vector<16x32xbf16>
    %42 = vector.extract_strided_slice %20 {offsets = [0, 160], sizes = [16, 32], strides = [1, 1]} : vector<16x384xbf16> to vector<16x32xbf16>
    %43 = vector.extract_strided_slice %20 {offsets = [0, 288], sizes = [16, 32], strides = [1, 1]} : vector<16x384xbf16> to vector<16x32xbf16>
    %cst_16 = arith.constant dense<0.000000e+00> : vector<16x16xf32>
    %44 = tpu.matmul %41, %42, %cst_16 {dimension_numbers = #tpu.dot_dimension_numbers<[1], [1], [0], [0], [0, 0, 1, 0], [], []>} : vector<16x32xbf16>, vector<16x32xbf16>, vector<16x16xf32> -> vector<16x16xf32>
    %cst_17 = arith.constant 0.176776692 : f32
    %45 = vector.broadcast %cst_17 : f32 to vector<16x16xf32>
    %46 = arith.mulf %44, %45 : vector<16x16xf32>
    %47 = vector.broadcast %12 : vector<1x16xf32> to vector<16x16xf32>
    %48 = arith.addf %46, %47 : vector<16x16xf32>
    %cst_18 = arith.constant dense<0xFF800000> : vector<16xf32>
    %49 = vector.multi_reduction <maximumf>, %48, %cst_18 [1] : vector<16x16xf32> to vector<16xf32>
    %50 = vector.shape_cast %49 : vector<16xf32> to vector<16x1xf32>
    %51 = vector.broadcast %50 : vector<16x1xf32> to vector<16x16xf32>
    %52 = arith.subf %48, %51 : vector<16x16xf32>
    %53 = math.exp %52 : vector<16x16xf32>
    %cst_19 = arith.constant dense<0.000000e+00> : vector<16xf32>
    %54 = vector.multi_reduction <add>, %53, %cst_19 [1] : vector<16x16xf32> to vector<16xf32>
    %55 = vector.shape_cast %54 : vector<16xf32> to vector<16x1xf32>
    %56 = tpu.reciprocal %55 {approx = true} : vector<16x1xf32> -> vector<16x1xf32>
    %57 = vector.broadcast %56 : vector<16x1xf32> to vector<16x16xf32>
    %58 = arith.mulf %53, %57 : vector<16x16xf32>
    %59 = arith.truncf %58 : vector<16x16xf32> to vector<16x16xbf16>
    %cst_20 = arith.constant dense<0.000000e+00> : vector<16x32xf32>
    %60 = tpu.matmul %59, %43, %cst_20 {dimension_numbers = #tpu.dot_dimension_numbers<[1], [0], [0], [1], [0, 0, 1, 1], [], []>} : vector<16x16xbf16>, vector<16x32xbf16>, vector<16x32xf32> -> vector<16x32xf32>
    %61 = vector.extract_strided_slice %20 {offsets = [0, 64], sizes = [16, 32], strides = [1, 1]} : vector<16x384xbf16> to vector<16x32xbf16>
    %62 = vector.extract_strided_slice %20 {offsets = [0, 192], sizes = [16, 32], strides = [1, 1]} : vector<16x384xbf16> to vector<16x32xbf16>
    %63 = vector.extract_strided_slice %20 {offsets = [0, 320], sizes = [16, 32], strides = [1, 1]} : vector<16x384xbf16> to vector<16x32xbf16>
    %cst_21 = arith.constant dense<0.000000e+00> : vector<16x16xf32>
    %64 = tpu.matmul %61, %62, %cst_21 {dimension_numbers = #tpu.dot_dimension_numbers<[1], [1], [0], [0], [0, 0, 1, 0], [], []>} : vector<16x32xbf16>, vector<16x32xbf16>, vector<16x16xf32> -> vector<16x16xf32>
    %cst_22 = arith.constant 0.176776692 : f32
    %65 = vector.broadcast %cst_22 : f32 to vector<16x16xf32>
    %66 = arith.mulf %64, %65 : vector<16x16xf32>
    %67 = vector.broadcast %12 : vector<1x16xf32> to vector<16x16xf32>
    %68 = arith.addf %66, %67 : vector<16x16xf32>
    %cst_23 = arith.constant dense<0xFF800000> : vector<16xf32>
    %69 = vector.multi_reduction <maximumf>, %68, %cst_23 [1] : vector<16x16xf32> to vector<16xf32>
    %70 = vector.shape_cast %69 : vector<16xf32> to vector<16x1xf32>
    %71 = vector.broadcast %70 : vector<16x1xf32> to vector<16x16xf32>
    %72 = arith.subf %68, %71 : vector<16x16xf32>
    %73 = math.exp %72 : vector<16x16xf32>
    %cst_24 = arith.constant dense<0.000000e+00> : vector<16xf32>
    %74 = vector.multi_reduction <add>, %73, %cst_24 [1] : vector<16x16xf32> to vector<16xf32>
    %75 = vector.shape_cast %74 : vector<16xf32> to vector<16x1xf32>
    %76 = tpu.reciprocal %75 {approx = true} : vector<16x1xf32> -> vector<16x1xf32>
    %77 = vector.broadcast %76 : vector<16x1xf32> to vector<16x16xf32>
    %78 = arith.mulf %73, %77 : vector<16x16xf32>
    %79 = arith.truncf %78 : vector<16x16xf32> to vector<16x16xbf16>
    %cst_25 = arith.constant dense<0.000000e+00> : vector<16x32xf32>
    %80 = tpu.matmul %79, %63, %cst_25 {dimension_numbers = #tpu.dot_dimension_numbers<[1], [0], [0], [1], [0, 0, 1, 1], [], []>} : vector<16x16xbf16>, vector<16x32xbf16>, vector<16x32xf32> -> vector<16x32xf32>
    %81 = vector.extract_strided_slice %20 {offsets = [0, 96], sizes = [16, 32], strides = [1, 1]} : vector<16x384xbf16> to vector<16x32xbf16>
    %82 = vector.extract_strided_slice %20 {offsets = [0, 224], sizes = [16, 32], strides = [1, 1]} : vector<16x384xbf16> to vector<16x32xbf16>
    %83 = vector.extract_strided_slice %20 {offsets = [0, 352], sizes = [16, 32], strides = [1, 1]} : vector<16x384xbf16> to vector<16x32xbf16>
    %cst_26 = arith.constant dense<0.000000e+00> : vector<16x16xf32>
    %84 = tpu.matmul %81, %82, %cst_26 {dimension_numbers = #tpu.dot_dimension_numbers<[1], [1], [0], [0], [0, 0, 1, 0], [], []>} : vector<16x32xbf16>, vector<16x32xbf16>, vector<16x16xf32> -> vector<16x16xf32>
    %cst_27 = arith.constant 0.176776692 : f32
    %85 = vector.broadcast %cst_27 : f32 to vector<16x16xf32>
    %86 = arith.mulf %84, %85 : vector<16x16xf32>
    %87 = vector.broadcast %12 : vector<1x16xf32> to vector<16x16xf32>
    %88 = arith.addf %86, %87 : vector<16x16xf32>
    %cst_28 = arith.constant dense<0xFF800000> : vector<16xf32>
    %89 = vector.multi_reduction <maximumf>, %88, %cst_28 [1] : vector<16x16xf32> to vector<16xf32>
    %90 = vector.shape_cast %89 : vector<16xf32> to vector<16x1xf32>
    %91 = vector.broadcast %90 : vector<16x1xf32> to vector<16x16xf32>
    %92 = arith.subf %88, %91 : vector<16x16xf32>
    %93 = math.exp %92 : vector<16x16xf32>
    %cst_29 = arith.constant dense<0.000000e+00> : vector<16xf32>
    %94 = vector.multi_reduction <add>, %93, %cst_29 [1] : vector<16x16xf32> to vector<16xf32>
    %95 = vector.shape_cast %94 : vector<16xf32> to vector<16x1xf32>
    %96 = tpu.reciprocal %95 {approx = true} : vector<16x1xf32> -> vector<16x1xf32>
    %97 = vector.broadcast %96 : vector<16x1xf32> to vector<16x16xf32>
    %98 = arith.mulf %93, %97 : vector<16x16xf32>
    %99 = arith.truncf %98 : vector<16x16xf32> to vector<16x16xbf16>
    %cst_30 = arith.constant dense<0.000000e+00> : vector<16x32xf32>
    %100 = tpu.matmul %99, %83, %cst_30 {dimension_numbers = #tpu.dot_dimension_numbers<[1], [0], [0], [1], [0, 0, 1, 1], [], []>} : vector<16x16xbf16>, vector<16x32xbf16>, vector<16x32xf32> -> vector<16x32xf32>
    %101 = tpu.concatenate %40, %60, %80, %100 in 1 : vector<16x32xf32>, vector<16x32xf32>, vector<16x32xf32>, vector<16x32xf32> -> vector<16x128xf32>
    %102 = arith.truncf %101 : vector<16x128xf32> to vector<16x128xbf16>
    %c0_31 = arith.constant 0 : index
    %c0_32 = arith.constant 0 : index
    %c0_33 = arith.constant 0 : index
    %103 = vector.load %arg8[%c0_31, %c0_32, %c0_33] : memref<1x128x128xbf16, #tpu.memory_space<vmem>>, vector<1x128x128xbf16>
    %104 = vector.shape_cast %103 : vector<1x128x128xbf16> to vector<128x128xbf16>
    %cst_34 = arith.constant dense<0.000000e+00> : vector<16x128xf32>
    %105 = tpu.matmul %102, %104, %cst_34 {dimension_numbers = #tpu.dot_dimension_numbers<[1], [0], [0], [1], [0, 0, 1, 1], [], []>} : vector<16x128xbf16>, vector<128x128xbf16>, vector<16x128xf32> -> vector<16x128xf32>
    %c0_35 = arith.constant 0 : index
    %c0_36 = arith.constant 0 : index
    %c0_37 = arith.constant 0 : index
    %106 = vector.load %arg9[%c0_35, %c0_36, %c0_37] : memref<1x1x128xf32, #tpu.memory_space<vmem>>, vector<1x1x128xf32>
    %107 = vector.shape_cast %106 : vector<1x1x128xf32> to vector<1x128xf32>
    %108 = vector.broadcast %107 : vector<1x128xf32> to vector<16x128xf32>
    %109 = arith.addf %105, %108 : vector<16x128xf32>
    %110 = arith.extf %4 : vector<16x128xbf16> to vector<16x128xf32>
    %111 = arith.addf %109, %110 : vector<16x128xf32>
    %c0_38 = arith.constant 0 : index
    %c0_39 = arith.constant 0 : index
    %c0_40 = arith.constant 0 : index
    %112 = vector.load %arg10[%c0_38, %c0_39, %c0_40] : memref<1x1x128xf32, #tpu.memory_space<vmem>>, vector<1x1x128xf32>
    %113 = vector.shape_cast %112 : vector<1x1x128xf32> to vector<1x128xf32>
    %c0_41 = arith.constant 0 : index
    %c0_42 = arith.constant 0 : index
    %c0_43 = arith.constant 0 : index
    %114 = vector.load %arg11[%c0_41, %c0_42, %c0_43] : memref<1x1x128xf32, #tpu.memory_space<vmem>>, vector<1x1x128xf32>
    %115 = vector.shape_cast %114 : vector<1x1x128xf32> to vector<1x128xf32>
    %cst_44 = arith.constant dense<0.000000e+00> : vector<16xf32>
    %116 = vector.multi_reduction <add>, %111, %cst_44 [1] : vector<16x128xf32> to vector<16xf32>
    %117 = vector.shape_cast %116 : vector<16xf32> to vector<16x1xf32>
    %cst_45 = arith.constant 1.280000e+02 : f32
    %118 = vector.broadcast %cst_45 : f32 to vector<16x1xf32>
    %119 = arith.divf %117, %118 : vector<16x1xf32>
    %120 = vector.broadcast %119 : vector<16x1xf32> to vector<16x128xf32>
    %121 = arith.subf %111, %120 : vector<16x128xf32>
    %122 = vector.broadcast %119 : vector<16x1xf32> to vector<16x128xf32>
    %123 = arith.subf %111, %122 : vector<16x128xf32>
    %124 = arith.mulf %121, %123 : vector<16x128xf32>
    %cst_46 = arith.constant dense<0.000000e+00> : vector<16xf32>
    %125 = vector.multi_reduction <add>, %124, %cst_46 [1] : vector<16x128xf32> to vector<16xf32>
    %126 = vector.shape_cast %125 : vector<16xf32> to vector<16x1xf32>
    %cst_47 = arith.constant 1.280000e+02 : f32
    %127 = vector.broadcast %cst_47 : f32 to vector<16x1xf32>
    %128 = arith.divf %126, %127 : vector<16x1xf32>
    %cst_48 = arith.constant 9.99999996E-13 : f32
    %129 = vector.broadcast %cst_48 : f32 to vector<16x1xf32>
    %130 = arith.addf %128, %129 : vector<16x1xf32>
    %131 = math.rsqrt %130 : vector<16x1xf32>
    %132 = vector.broadcast %119 : vector<16x1xf32> to vector<16x128xf32>
    %133 = arith.subf %111, %132 : vector<16x128xf32>
    %134 = vector.broadcast %131 : vector<16x1xf32> to vector<16x128xf32>
    %135 = arith.mulf %133, %134 : vector<16x128xf32>
    %136 = vector.broadcast %113 : vector<1x128xf32> to vector<16x128xf32>
    %137 = arith.mulf %135, %136 : vector<16x128xf32>
    %138 = vector.broadcast %115 : vector<1x128xf32> to vector<16x128xf32>
    %139 = arith.addf %137, %138 : vector<16x128xf32>
    %140 = arith.truncf %139 : vector<16x128xf32> to vector<16x128xbf16>
    %c0_49 = arith.constant 0 : index
    %c0_50 = arith.constant 0 : index
    %c0_51 = arith.constant 0 : index
    %141 = vector.load %arg12[%c0_49, %c0_50, %c0_51] : memref<1x128x512xbf16, #tpu.memory_space<vmem>>, vector<1x128x512xbf16>
    %142 = vector.shape_cast %141 : vector<1x128x512xbf16> to vector<128x512xbf16>
    %cst_52 = arith.constant dense<0.000000e+00> : vector<16x512xf32>
    %143 = tpu.matmul %140, %142, %cst_52 {dimension_numbers = #tpu.dot_dimension_numbers<[1], [0], [0], [1], [0, 0, 1, 1], [], []>} : vector<16x128xbf16>, vector<128x512xbf16>, vector<16x512xf32> -> vector<16x512xf32>
    %c0_53 = arith.constant 0 : index
    %c0_54 = arith.constant 0 : index
    %c0_55 = arith.constant 0 : index
    %144 = vector.load %arg13[%c0_53, %c0_54, %c0_55] : memref<1x1x512xf32, #tpu.memory_space<vmem>>, vector<1x1x512xf32>
    %145 = vector.shape_cast %144 : vector<1x1x512xf32> to vector<1x512xf32>
    %146 = vector.broadcast %145 : vector<1x512xf32> to vector<16x512xf32>
    %147 = arith.addf %143, %146 : vector<16x512xf32>
    %cst_56 = arith.constant 5.000000e-01 : f32
    %148 = vector.broadcast %cst_56 : f32 to vector<16x512xf32>
    %149 = arith.mulf %148, %147 : vector<16x512xf32>
    %cst_57 = arith.constant 4.471500e-02 : f32
    %150 = vector.broadcast %cst_57 : f32 to vector<16x512xf32>
    %151 = arith.mulf %150, %147 : vector<16x512xf32>
    %152 = arith.mulf %151, %147 : vector<16x512xf32>
    %153 = arith.mulf %152, %147 : vector<16x512xf32>
    %154 = arith.addf %147, %153 : vector<16x512xf32>
    %cst_58 = arith.constant 0.797884583 : f32
    %155 = vector.broadcast %cst_58 : f32 to vector<16x512xf32>
    %156 = arith.mulf %155, %154 : vector<16x512xf32>
    %157 = math.tanh %156 : vector<16x512xf32>
    %cst_59 = arith.constant 1.000000e+00 : f32
    %158 = vector.broadcast %cst_59 : f32 to vector<16x512xf32>
    %159 = arith.addf %158, %157 : vector<16x512xf32>
    %160 = arith.mulf %149, %159 : vector<16x512xf32>
    %161 = arith.truncf %160 : vector<16x512xf32> to vector<16x512xbf16>
    %c0_60 = arith.constant 0 : index
    %c0_61 = arith.constant 0 : index
    %c0_62 = arith.constant 0 : index
    %162 = vector.load %arg14[%c0_60, %c0_61, %c0_62] : memref<1x512x128xbf16, #tpu.memory_space<vmem>>, vector<1x512x128xbf16>
    %163 = vector.shape_cast %162 : vector<1x512x128xbf16> to vector<512x128xbf16>
    %cst_63 = arith.constant dense<0.000000e+00> : vector<16x128xf32>
    %164 = tpu.matmul %161, %163, %cst_63 {dimension_numbers = #tpu.dot_dimension_numbers<[1], [0], [0], [1], [0, 0, 1, 1], [], []>} : vector<16x512xbf16>, vector<512x128xbf16>, vector<16x128xf32> -> vector<16x128xf32>
    %c0_64 = arith.constant 0 : index
    %c0_65 = arith.constant 0 : index
    %c0_66 = arith.constant 0 : index
    %165 = vector.load %arg15[%c0_64, %c0_65, %c0_66] : memref<1x1x128xf32, #tpu.memory_space<vmem>>, vector<1x1x128xf32>
    %166 = vector.shape_cast %165 : vector<1x1x128xf32> to vector<1x128xf32>
    %167 = vector.broadcast %166 : vector<1x128xf32> to vector<16x128xf32>
    %168 = arith.addf %164, %167 : vector<16x128xf32>
    %169 = arith.addf %168, %139 : vector<16x128xf32>
    %c0_67 = arith.constant 0 : index
    %c0_68 = arith.constant 0 : index
    %c0_69 = arith.constant 0 : index
    %170 = vector.load %arg16[%c0_67, %c0_68, %c0_69] : memref<1x1x128xf32, #tpu.memory_space<vmem>>, vector<1x1x128xf32>
    %171 = vector.shape_cast %170 : vector<1x1x128xf32> to vector<1x128xf32>
    %c0_70 = arith.constant 0 : index
    %c0_71 = arith.constant 0 : index
    %c0_72 = arith.constant 0 : index
    %172 = vector.load %arg17[%c0_70, %c0_71, %c0_72] : memref<1x1x128xf32, #tpu.memory_space<vmem>>, vector<1x1x128xf32>
    %173 = vector.shape_cast %172 : vector<1x1x128xf32> to vector<1x128xf32>
    %cst_73 = arith.constant dense<0.000000e+00> : vector<16xf32>
    %174 = vector.multi_reduction <add>, %169, %cst_73 [1] : vector<16x128xf32> to vector<16xf32>
    %175 = vector.shape_cast %174 : vector<16xf32> to vector<16x1xf32>
    %cst_74 = arith.constant 1.280000e+02 : f32
    %176 = vector.broadcast %cst_74 : f32 to vector<16x1xf32>
    %177 = arith.divf %175, %176 : vector<16x1xf32>
    %178 = vector.broadcast %177 : vector<16x1xf32> to vector<16x128xf32>
    %179 = arith.subf %169, %178 : vector<16x128xf32>
    %180 = vector.broadcast %177 : vector<16x1xf32> to vector<16x128xf32>
    %181 = arith.subf %169, %180 : vector<16x128xf32>
    %182 = arith.mulf %179, %181 : vector<16x128xf32>
    %cst_75 = arith.constant dense<0.000000e+00> : vector<16xf32>
    %183 = vector.multi_reduction <add>, %182, %cst_75 [1] : vector<16x128xf32> to vector<16xf32>
    %184 = vector.shape_cast %183 : vector<16xf32> to vector<16x1xf32>
    %cst_76 = arith.constant 1.280000e+02 : f32
    %185 = vector.broadcast %cst_76 : f32 to vector<16x1xf32>
    %186 = arith.divf %184, %185 : vector<16x1xf32>
    %cst_77 = arith.constant 9.99999996E-13 : f32
    %187 = vector.broadcast %cst_77 : f32 to vector<16x1xf32>
    %188 = arith.addf %186, %187 : vector<16x1xf32>
    %189 = math.rsqrt %188 : vector<16x1xf32>
    %190 = vector.broadcast %177 : vector<16x1xf32> to vector<16x128xf32>
    %191 = arith.subf %169, %190 : vector<16x128xf32>
    %192 = vector.broadcast %189 : vector<16x1xf32> to vector<16x128xf32>
    %193 = arith.mulf %191, %192 : vector<16x128xf32>
    %194 = vector.broadcast %171 : vector<1x128xf32> to vector<16x128xf32>
    %195 = arith.mulf %193, %194 : vector<16x128xf32>
    %196 = vector.broadcast %173 : vector<1x128xf32> to vector<16x128xf32>
    %197 = arith.addf %195, %196 : vector<16x128xf32>
    %198 = arith.truncf %197 : vector<16x128xf32> to vector<16x128xbf16>
    %c0_78 = arith.constant 0 : index
    %c0_79 = arith.constant 0 : index
    %c0_80 = arith.constant 0 : index
    %199 = vector.load %arg18[%c0_78, %c0_79, %c0_80] : memref<1x16x128xbf16, #tpu.memory_space<vmem>>, vector<1x16x128xbf16>
    %200 = vector.shape_cast %199 : vector<1x16x128xbf16> to vector<16x128xbf16>
    %201 = vector.shape_cast %198 : vector<16x128xbf16> to vector<1x16x128xbf16>
    tpu.vector_store %arg18[%c0_78, %c0_79, %c0_80], %201 {strides = array<i32>} : memref<1x16x128xbf16, #tpu.memory_space<vmem>>, vector<1x16x128xbf16>,
    return
  }
  func.func @transform_0(%arg0: i32, %arg1: i32, %arg2: memref<2xi32, #tpu.memory_space<smem>>) -> (i32, i32, i32) {
    %c0_i32 = arith.constant 0 : i32
    %c0_i32_0 = arith.constant 0 : i32
    %c0_i32_1 = arith.constant 0 : i32
    return %arg0, %c0_i32, %c0_i32_0 : i32, i32, i32
  }
  func.func @transform_1(%arg0: i32, %arg1: i32, %arg2: memref<2xi32, #tpu.memory_space<smem>>) -> (i32, i32) {
    %c0_i32 = arith.constant 0 : i32
    %c0_i32_0 = arith.constant 0 : i32
    %c0_i32_1 = arith.constant 0 : i32
    return %c0_i32, %c0_i32_0 : i32, i32
  }
  func.func @transform_2(%arg0: i32, %arg1: i32, %arg2: memref<2xi32, #tpu.memory_space<smem>>) -> (i32, i32) {
    %c0_i32 = arith.constant 0 : i32
    %c0_i32_0 = arith.constant 0 : i32
    %c0_i32_1 = arith.constant 0 : i32
    return %c0_i32, %c0_i32_0 : i32, i32
  }
  func.func @transform_3(%arg0: i32, %arg1: i32, %arg2: memref<2xi32, #tpu.memory_space<smem>>) -> (i32, i32, i32) {
    %c0_i32 = arith.constant 0 : i32
    %c0_i32_0 = arith.constant 0 : i32
    %c0_i32_1 = arith.constant 0 : i32
    return %arg1, %c0_i32, %c0_i32_0 : i32, i32, i32
  }
  func.func @transform_4(%arg0: i32, %arg1: i32, %arg2: memref<2xi32, #tpu.memory_space<smem>>) -> (i32, i32, i32) {
    %c0_i32 = arith.constant 0 : i32
    %c0_i32_0 = arith.constant 0 : i32
    %c0_i32_1 = arith.constant 0 : i32
    return %arg1, %c0_i32, %c0_i32_0 : i32, i32, i32
  }
  func.func @transform_5(%arg0: i32, %arg1: i32, %arg2: memref<2xi32, #tpu.memory_space<smem>>) -> (i32, i32, i32) {
    %c0_i32 = arith.constant 0 : i32
    %c0_i32_0 = arith.constant 0 : i32
    %c0_i32_1 = arith.constant 0 : i32
    return %arg1, %c0_i32, %c0_i32_0 : i32, i32, i32
  }
  func.func @transform_6(%arg0: i32, %arg1: i32, %arg2: memref<2xi32, #tpu.memory_space<smem>>) -> (i32, i32, i32) {
    %c0_i32 = arith.constant 0 : i32
    %c0_i32_0 = arith.constant 0 : i32
    %c0_i32_1 = arith.constant 0 : i32
    return %arg1, %c0_i32, %c0_i32_0 : i32, i32, i32
  }
  func.func @transform_7(%arg0: i32, %arg1: i32, %arg2: memref<2xi32, #tpu.memory_space<smem>>) -> (i32, i32, i32) {
    %c0_i32 = arith.constant 0 : i32
    %c0_i32_0 = arith.constant 0 : i32
    %c0_i32_1 = arith.constant 0 : i32
    return %arg1, %c0_i32, %c0_i32_0 : i32, i32, i32
  }
  func.func @transform_8(%arg0: i32, %arg1: i32, %arg2: memref<2xi32, #tpu.memory_space<smem>>) -> (i32, i32, i32) {
    %c0_i32 = arith.constant 0 : i32
    %c0_i32_0 = arith.constant 0 : i32
    %c0_i32_1 = arith.constant 0 : i32
    return %arg1, %c0_i32, %c0_i32_0 : i32, i32, i32
  }
  func.func @transform_9(%arg0: i32, %arg1: i32, %arg2: memref<2xi32, #tpu.memory_space<smem>>) -> (i32, i32, i32) {
    %c0_i32 = arith.constant 0 : i32
    %c0_i32_0 = arith.constant 0 : i32
    %c0_i32_1 = arith.constant 0 : i32
    return %arg1, %c0_i32, %c0_i32_0 : i32, i32, i32
  }
  func.func @transform_10(%arg0: i32, %arg1: i32, %arg2: memref<2xi32, #tpu.memory_space<smem>>) -> (i32, i32, i32) {
    %c0_i32 = arith.constant 0 : i32
    %c0_i32_0 = arith.constant 0 : i32
    %c0_i32_1 = arith.constant 0 : i32
    return %arg1, %c0_i32, %c0_i32_0 : i32, i32, i32
  }
  func.func @transform_11(%arg0: i32, %arg1: i32, %arg2: memref<2xi32, #tpu.memory_space<smem>>) -> (i32, i32, i32) {
    %c0_i32 = arith.constant 0 : i32
    %c0_i32_0 = arith.constant 0 : i32
    %c0_i32_1 = arith.constant 0 : i32
    return %arg1, %c0_i32, %c0_i32_0 : i32, i32, i32
  }
  func.func @transform_12(%arg0: i32, %arg1: i32, %arg2: memref<2xi32, #tpu.memory_space<smem>>) -> (i32, i32, i32) {
    %c0_i32 = arith.constant 0 : i32
    %c0_i32_0 = arith.constant 0 : i32
    %c0_i32_1 = arith.constant 0 : i32
    return %arg1, %c0_i32, %c0_i32_0 : i32, i32, i32
  }
  func.func @transform_13(%arg0: i32, %arg1: i32, %arg2: memref<2xi32, #tpu.memory_space<smem>>) -> (i32, i32, i32) {
    %c0_i32 = arith.constant 0 : i32
    %c0_i32_0 = arith.constant 0 : i32
    %c0_i32_1 = arith.constant 0 : i32
    return %arg1, %c0_i32, %c0_i32_0 : i32, i32, i32
  }
  func.func @transform_14(%arg0: i32, %arg1: i32, %arg2: memref<2xi32, #tpu.memory_space<smem>>) -> (i32, i32, i32) {
    %c0_i32 = arith.constant 0 : i32
    %c0_i32_0 = arith.constant 0 : i32
    %c0_i32_1 = arith.constant 0 : i32
    return %arg1, %c0_i32, %c0_i32_0 : i32, i32, i32
  }
  func.func @transform_15(%arg0: i32, %arg1: i32, %arg2: memref<2xi32, #tpu.memory_space<smem>>) -> (i32, i32, i32) {
    %c0_i32 = arith.constant 0 : i32
    %c0_i32_0 = arith.constant 0 : i32
    %c0_i32_1 = arith.constant 0 : i32
    return %arg0, %c0_i32, %c0_i32_0 : i32, i32, i32
  }
}

</mosaic_0001>

<bundles_post_ra>
// kernel: bert_forward.3
= control target key start
LH: loop header
LB: loop body
LE: loop exit
PB: predicated region body
PF: predicated region fallthrough
CT: control target
= control target key end

     0   :  { %s364_s1 = inlined_call_operand.vmem [shape: bf16[128,128], index: 1, kind: input, shape index: {}]   ;;  %s365_s3 = inlined_call_operand.vmem [shape: bf16[128,128], index: 3, kind: input, shape index: {}]   ;;  %s366_s2 = inlined_call_operand.vmem [shape: f32[1,128], index: 2, kind: input, shape index: {}]   ;;  %s367_s0 = inlined_call_operand.vmem [shape: bf16[8,128], index: 0, kind: input, shape index: {}]   ;;  %s368_s4 = inlined_call_operand.vmem [shape: f32[1,128], index: 4, kind: input, shape index: {}]   ;;  %s369_s5 = inlined_call_operand.vmem [shape: f32[8,128], index: 5, kind: output, shape index: {}]  }
   0x1   :  { %v261_v0 = vld [vmem:[%s364_s1 + $0x38] sm:$0xff]  ;;  %v260_v1 = vld [vmem:[%s364_s1 + $0x30] sm:$0xff]  ;;  %v259_v4 = vld [vmem:[%s364_s1 + $0x28] sm:$0xff] }
   0x2   :  { %89 = vmatpush.bf16.msra.mxu0 %v261_v0  ;;  %v269_v2 = vld [vmem:[%s365_s3 + $0x38] sm:$0xff]  ;;  %v268_v3 = vld [vmem:[%s365_s3 + $0x30] sm:$0xff]  ;;  %v267_v5 = vld [vmem:[%s365_s3 + $0x28] sm:$0xff] }
   0x3   :  { %172 = vmatpush.bf16.msra.mxu1 %v269_v2  ;;  %v258_v6 = vld [vmem:[%s364_s1 + $0x20] sm:$0xff]  ;;  %v257_v8 = vld [vmem:[%s364_s1 + $0x18] sm:$0xff]  ;;  %v256_v10 = vld [vmem:[%s364_s1 + $0x10] sm:$0xff] }
   0x4   :  { %v266_v7 = vld [vmem:[%s365_s3 + $0x20] sm:$0xff]  ;;  %v265_v9 = vld [vmem:[%s365_s3 + $0x18] sm:$0xff]  ;;  %v255_v11 = vld [vmem:[%s364_s1 + $0x8] sm:$0xff] }
   0x5   :  { %v254_v12 = vld [vmem:[%s364_s1] sm:$0xff]  ;;  %v264_v14 = vld [vmem:[%s365_s3 + $0x10] sm:$0xff]  ;;  %v263_v15 = vld [vmem:[%s365_s3 + $0x8] sm:$0xff] }
   0x6   :  { %90 = vmatpush.bf16.msra.mxu0 %v260_v1  ;;  %v20_v13 = vld [vmem:[%s367_s0] sm:$0xf] }
   0x7   :  { %173 = vmatpush.bf16.msra.mxu1 %v268_v3  ;;  %v262_v16 = vld [vmem:[%s365_s3] sm:$0xff] }
   0x8   :  { %v270_v17 = vld [vmem:[%s366_s2] ss:$0 sm:$0xff] }
   0x9   :  { %v271_v23 = vld [vmem:[%s368_s4] ss:$0 sm:$0xff] }
   0xa   :  { %91 = vmatpush.bf16.msra.mxu0 %v259_v4 }
   0xb   :  { %174 = vmatpush.bf16.msra.mxu1 %v267_v5 }
   0xe   :  { %92 = vmatpush.bf16.msra.mxu0 %v258_v6 }
   0xf   :  { %175 = vmatpush.bf16.msra.mxu1 %v266_v7 }
  0x12   :  { %93 = vmatpush.bf16.msra.mxu0 %v257_v8 }
  0x13   :  { %176 = vmatpush.bf16.msra.mxu1 %v265_v9 }
  0x16   :  { %94 = vmatpush.bf16.msra.mxu0 %v256_v10 }
  0x17   :  { %177 = vmatpush.bf16.msra.mxu1 %v264_v14 }
  0x1a   :  { %95 = vmatpush.bf16.msra.mxu0 %v255_v11 }
  0x1b   :  { %178 = vmatpush.bf16.msra.mxu1 %v263_v15 }
  0x1e   :  { %96 = vmatpush.bf16.msra.mxu0 %v254_v12 }
  0x1f   :  { %179 = vmatpush.bf16.msra.mxu1 %v262_v16 }
  0x21   :  { %97 = vmatmul.bf16.vlgmr.msra.gmra.mxu0 %v20_v13 }
  0x9e   :  { %v98_v18 = vpop.f32.mrf.mxu0 }
  0x9f   :  { %v99_v19 = vadd.f32 %v270_v17, %v98_v18 }
  0xa1   :  { %272 = vtanh.f32 %v99_v19 }
  0xa6   :  { %v100_v20 = vpop.f32.mrf.mxu0 }
  0xa7   :  { %v273_v21 = vpop.eup %272 }
  0xa8   :  { %v103_v22 = vpack.c.bf16 %v273_v21, %v273_v21 }
  0xaa   :  { %180 = vmatmul.bf16.vlgmr.msra.gmra.mxu1 %v103_v22 }
 0x127   :  { %v181_v24 = vpop.f32.mrf.mxu1 }
 0x128   :  { %v182_v25 = vadd.f32 %v271_v23, %v181_v24 }
 0x12a   :  { %185 = vst [vmem:[%s369_s5] sm:$0xff] %v182_v25 }
 0x12f   :  { %v183_v26 = vpop.f32.mrf.mxu1 }

// kernel: bert_forward.2
= control target key start
LH: loop header
LB: loop body
LE: loop exit
PB: predicated region body
PF: predicated region fallthrough
CT: control target
= control target key end

     0   :  { %s3311_s24 = smov [#allocation3]   ;;  %s3927_s0 = inlined_call_operand.vmem [shape: s32[2], index: 0, kind: input, shape index: {}]   ;;  %s3928_s1 = inlined_call_operand.vmem [shape: bf16[2,16,128], index: 1, kind: input, shape index: {}]   ;;  %s3929_s2 = inlined_call_operand.vmem [shape: f32[1,128], index: 2, kind: input, shape index: {}]   ;;  %s3930_s3 = inlined_call_operand.vmem [shape: f32[1,128], index: 3, kind: input, shape index: {}]   ;;  %s3931_s4 = inlined_call_operand.hbm [shape: bf16[2,128,384], index: 4, kind: input, shape index: {}]   ;;  %s3932_s5 = inlined_call_operand.vmem [shape: f32[2,1,384], index: 5, kind: input, shape index: {}]   ;;  %s3933_s6 = inlined_call_operand.vmem [shape: bf16[2,128,128], index: 6, kind: input, shape index: {}]   ;;  %s3934_s7 = inlined_call_operand.vmem [shape: f32[2,1,128], index: 7, kind: input, shape index: {}]   ;;  %s3935_s8 = inlined_call_operand.vmem [shape: f32[2,1,128], index: 8, kind: input, shape index: {}]   ;;  %s3936_s9 = inlined_call_operand.vmem [shape: f32[2,1,128], index: 9, kind: input, shape index: {}]   ;;  %s3937_s10 = inlined_call_operand.vmem [shape: bf16[2,128,512], index: 10, kind: input, shape index: {}]   ;;  %s3938_s11 = inlined_call_operand.vmem [shape: f32[2,1,512], index: 11, kind: input, shape index: {}]   ;;  %s3939_s12 = inlined_call_operand.hbm [shape: bf16[2,512,128], index: 12, kind: input, shape index: {}]   ;;  %s3940_s13 = inlined_call_operand.vmem [shape: f32[2,1,128], index: 13, kind: input, shape index: {}]   ;;  %s3941_s14 = inlined_call_operand.vmem [shape: f32[2,1,128], index: 14, kind: input, shape index: {}]   ;;  %s3942_s15 = inlined_call_operand.vmem [shape: f32[2,1,128], index: 15, kind: input, shape index: {}]   ;;  %s3943_s16 = inlined_call_operand.vmem [shape: bf16[2,16,128], index: 16, kind: output, shape index: {}]  }
   0x1   :  { %3951 = sst [smem:[#allocation20_spill]] %s3927_s0 }
   0x2   :  { %3952 = sst [smem:[#allocation21_spill]] %s3928_s1 }
   0x3   :  { %3953 = sst [smem:[#allocation22_spill]] %s3929_s2 }
   0x4   :  { %3954 = sst [smem:[#allocation23_spill]] %s3930_s3 }
   0x5   :  { %3955 = sst [smem:[#allocation24_spill]] %s3931_s4 }
   0x6   :  { %3956 = sst [smem:[#allocation25_spill]] %s3932_s5 }
   0x7   :  { %3957 = sst [smem:[#allocation26_spill]] %s3933_s6 }
   0x8   :  { %3958 = sst [smem:[#allocation27_spill]] %s3935_s8 }
   0x9   :  { %3959 = sst [smem:[#allocation28_spill]] %s3936_s9 }
   0xa   :  { %3960 = sst [smem:[#allocation29_spill]] %s3937_s10 }
   0xb   :  { %3961 = sst [smem:[#allocation30_spill]] %s3938_s11 }
   0xc   :  { %3962 = sst [smem:[#allocation31_spill]] %s3939_s12 }
   0xd   :  { %3963 = sst [smem:[#allocation32_spill]] %s3940_s13 }
   0xe   :  { %3964 = sst [smem:[#allocation33_spill]] %s3941_s14 }
   0xf   :  { %3965 = sst [smem:[#allocation34_spill]] %s3942_s15 }
  0x10   :  { %3966 = sst [smem:[#allocation35_spill]] %s3943_s16 }
  0x11   :  { %s3967_s23 = sld [smem:[#allocation20_spill]] }
  0x17   :  { %s22_s3 = sshll.u32 %s3967_s23, 4  ;;  %s23_s3 = int_to_ptr.vmem [resolvable:$true] %s22_s3 }
  0x18   :  { %25 = dma.vmem_to_smem %s23_s3, 16, %s3311_s24, [#allocation2] }
  0x19   :  { %3269 = dma.done.wait [#allocation2], 16 }
  0x1a   :  { %3270 = vsyncadd [#allocation2], 4294967280 }
  0x1b   :  { %28 = sfence }
  0x1c   :  { %29 = vsyncpa [#allocation5], 0 }
  0x1d   :  { %31 = vsyncpa [#allocation5 + $0x1], 0 }
  0x1e   :  { %32 = vsyncpa [#allocation7], 0 }
  0x1f   :  { %34 = vsyncpa [#allocation7 + $0x1], 0  ;;  %s3410_s25 = smov 0   ;;  %s3412_s26 = smov 0  }
  0x20   :  { %s3414_s27 = smov 0   ;;  %s3416_s28 = smov 0  }
  0x21   :  { %s3418_s29 = smov 0   ;;  %s3420_s30 = smov 0  }
  0x22   :  { %s3422_s3 = smov 0   ;;  %s3424_s0 = smov 0  }
  0x23 LB: > { %3968 = sst [smem:[#allocation11_spill]] %s3285_s26  ;;  %s2453_s17 = sadd.s32 4294967295, %s3309_s0   ;;  %s3309_s0 = sphi %s3424_s0, %s40_s0   ;;  %s3305_s3 = sphi %s3422_s3, %s4010_s3   ;;  %s3301_s30 = sphi %s3420_s30, %s4009_s30   ;;  %s3297_s29 = sphi %s3418_s29, %s4008_s29   ;;  %s3293_s28 = sphi %s3416_s28, %s4007_s28   ;;  %s3289_s27 = sphi %s3414_s27, %s4006_s27   ;;  %s3285_s26 = sphi %s3412_s26, %s4005_s26   ;;  %s3281_s25 = sphi %s3410_s25, %s4004_s25  }
  0x24   : > { %3969 = sst [smem:[#allocation12_spill]] %s3289_s27  ;;  %s49_s18 = sadd.s32 1, %s3301_s30 }
  0x25   : > { %3970 = sst [smem:[#allocation13_spill]] %s3301_s30  ;;  %p50_p0 = scmp.ge.s32.totalorder %s49_s18, 2 }
  0x26   : > { %3971 = sst [smem:[#allocation14_spill]] %s3305_s3  ;;  %s52_s19 = sadd.s32 1, %s3305_s3 }
  0x27   : > { %3972 = sst [smem:[#allocation15_spill]] %s3309_s0  ;;  %s127_s20 = sadd.s32 1, %s3289_s27 }
  0x28   : > { %p134_p1 = scmp.ne.s32.totalorder %s3289_s27, %s3285_s26  ;;  %s4012_s18 = smov (%p50_p0, %s49_s18), 0 }
  0x29   : > { %3973 = sst [smem:[#allocation16_spill]] %s4012_s18  ;;  %s4014_s19 = smov (!%p50_p0, %s52_s19), %s3305_s3 }
  0x2a   : > { %s124_s21 = ssub.s32 %s3301_s30, %s4012_s18  ;;  %p135_p2 = scmp.eq.s32.totalorder %s3309_s0, 0 }
  0x2b   : > { %p54_p3 = scmp.ge.s32.totalorder %s4014_s19, 2  ;;  %p125_p4 = scmp.eq.s32.totalorder %s124_s21, 0 }
  0x2c   : > { %p136_p5 = por %p135_p2, %p134_p1  ;;  %p140_p6 = scmp.ne.s32.totalorder %s3285_s26, %s3281_s25 }
  0x2d   : > { %s4016_s19 = smov (%p54_p3, %s4014_s19), 0  ;;  %p141_p7 = scmp.eq.s32.totalorder %s2453_s17, 0 }
  0x2e   : > { %3974 = sst [smem:[#allocation17_spill]] %s4016_s19  ;;  %p3002_p8 = scmp.lt.s32.totalorder %s3309_s0, 4 }
  0x2f   : > { %s3464_s22 = scalar_select %p125_p4, %s3289_s27, %s127_s20  }
  0x30   : > { %s3468_s23 = sand.u32 1, %s3289_s27   ;;  %p3470_p9 = por %p141_p7, %p140_p6 }
  0x31   : > { %3975 = sst [smem:[#allocation18_spill]] %s3464_s22  ;;  %s2987_s21 = smul.u32 192, %s3468_s23 }
  0x32   : > { %p3475_p10 = pnand %p3002_p8, %p136_p5  ;;  %s2988_s17 = smul.u32 192, %s3301_s30 }
  0x33   : > { %s3978_s4 = sld [smem:[#allocation24_spill]]  ;;  %s494_s3 = scalar_lea.vmem [#allocation4], %s2987_s21 }
  0x34   : > { %s502_s22 = sshll.u32 %s494_s3, 4  ;;  %s491_s2 = scalar_lea.sflag [#allocation5], %s3468_s23  ;;  %s503_s22 = int_to_ptr.vmem [resolvable:$true] %s502_s22 }
  0x35   : > { %s3312_s16 = smov 192   ;;  %s3313_s15 = smov 12  }
  0x36   : > { %p2461_p11 = scmp.ge.s32.totalorder %s3309_s0, 1  ;;  %p598_p12 = scmp.lt.s32.totalorder %s3309_s0, 5 }
  0x37   : > { %s2458_s14 = sshll.u32 %s3468_s23, 8  ;;  %s2871_s13 = sshll.u32 %s3301_s30, 8 }
  0x38   : > { %p599_p13 = pnand %p2461_p11, %p598_p12  ;;  %s564_s11 = scalar_lea.vmem [#allocation6], %s2458_s14 }
  0x39   : > { %s499_s18 = scalar_lea.hbm %s3978_s4, %s2988_s17  ;;  %s572_s19 = sshll.u32 %s564_s11, 4  ;;  %s573_s19 = int_to_ptr.vmem [resolvable:$true] %s572_s19 }
  0x3a   : > { %s500_s27 = sshll.u32 %s499_s18, 4  ;;  %s3979_s12 = sld [smem:[#allocation31_spill]]  ;;  %s501_s27 = int_to_ptr.hbm [resolvable:$true] %s500_s27 }
  0x3b   : > { %2998 = dma.hbm_to_vmem [thread:$0]  (!%p3475_p10), %s501_s27, 3072, %s503_s22, %s491_s2, %s3312_s16, %s3312_s16, %s3313_s15  }
  0x3c   : > { %s561_s20 = scalar_lea.sflag [#allocation7], %s3468_s23  ;;  %s3314_s4 = smov 64  }
  0x3d   : > { %s3315_s10 = smov 4  }
  0x3e   : > { %602 = sbr.rel (%p599_p13) target bundleno = 2646 (0xa56), region = 80 }
  0x40   : > { %s569_s3 = scalar_lea.hbm %s3979_s12, %s2871_s13 }
  0x41   : > { %s570_s18 = sshll.u32 %s569_s3, 4  ;;  %s571_s18 = int_to_ptr.hbm [resolvable:$true] %s570_s18 }
  0x42   : > { %3001 = dma.hbm_to_vmem [thread:$0]  (!%p3475_p10), %s571_s18, 4096, %s573_s19, %s561_s20, %s3314_s4, %s3314_s4, %s3315_s10  }
  0x43   : > { %s604_s2 = sand.u32 1, %s3285_s26  }
  0x44   : > { %s2989_s15 = smul.u32 192, %s604_s2  ;;  %s605_s16 = scalar_lea.sflag [#allocation5], %s604_s2 }
  0x46   : > { %s3497_s14 = scalar_lea.vmem [#allocation4], %s2989_s15 }
  0x47   : > { %3272 = dma.done.wait (%p3470_p9), %s605_s16, 3072  }
  0x48   : > { %3274 = vsyncadd (%p3470_p9), %s605_s16, 4294964224  ;;  %s2462_s11 = sshll.u32 %s604_s2, 8  ;;  %s615_s13 = scalar_lea.sflag [#allocation7], %s604_s2 }
  0x49   : > { %s3503_s27 = scalar_lea.vmem [#allocation6], %s2462_s11 }
  0x4a   : > { %3980 = sst [smem:[#allocation19_spill]] %s3503_s27 }
  0x4b   : > { %3276 = dma.done.wait (%p3470_p9), %s615_s13, 4096  }
  0x4c   : > { %3278 = vsyncadd (%p3470_p9), %s615_s13, 4294963200  ;;  %p712_p0 = scmp.lt.s32.totalorder %s3297_s29, 1  ;;  %p717_p1 = scmp.lt.s32.totalorder %s3293_s28, 1 }
  0x4d   : > { %s3981_s1 = sld [smem:[#allocation21_spill]]  ;;  %p2472_p2 = scmp.ne.s32.totalorder %s3293_s28, 0 }
  0x4e   : > { %s713_s4 = scalar_select %p712_p0, %s3297_s29, 1 }
  0x4f   : > { %s3513_s10 = scalar_select %p717_p1, %s3293_s28, 1 }
  0x50   : > { %s2872_s22 = sshll.u32 %s713_s4, 3  ;;  %s3982_s5 = sld [smem:[#allocation25_spill]] }
  0x51   : > { %s2990_s19 = smul.u32 3, %s3513_s10  ;;  %s2873_s17 = sshll.u32 %s3513_s10, 6 }
  0x52   : > { %s3983_s6 = sld [smem:[#allocation26_spill]]  ;;  %s2874_s21 = sshll.u32 %s3513_s10, 8 }
  0x53   : > { %s716_s25 = scalar_lea.vmem %s3981_s1, %s2872_s22  ;;  %s2469_s3 = sshll.u32 %s3513_s10, 2 }
  0x54   : > { %s3986_s20 = sld [smem:[#allocation29_spill]] }
  0x55   : > { %s3987_s16 = sld [smem:[#allocation30_spill]] }
  0x56   : > { %s3527_s15 = scalar_lea.vmem %s3982_s5, %s2990_s19  ;;  %s3988_s12 = sld [smem:[#allocation32_spill]] }
  0x57   : > { %s3989_s1 = sld [smem:[#allocation33_spill]] }
  0x58   : > { %s3532_s13 = scalar_lea.vmem %s3983_s6, %s2873_s17  ;;  %s3990_s27 = sld [smem:[#allocation34_spill]] }
  0x59   : > { %s3992_s9 = sld [smem:[#allocation22_spill]] (!%p2472_p2) }
  0x5a   : > { %s3547_s19 = scalar_lea.vmem %s3986_s20, %s2874_s21  ;;  %s3991_s21 = sld [smem:[#allocation35_spill]] }
  0x5b   : > { %s3552_s17 = scalar_lea.vmem %s3987_s16, %s2469_s3  ;;  %s3993_s0 = sld [smem:[#allocation23_spill]] (!%p2472_p2) }
  0x5c   : > { %s746_s4 = scalar_lea.vmem %s3988_s12, %s3513_s10  ;;  %762 = sbr.rel (%p2472_p2) target bundleno = 377 (0x179), region = 92 }
  0x5d   : > { %s749_s24 = scalar_lea.vmem %s3989_s1, %s3513_s10 }
  0x5e   : > { %s752_s8 = scalar_lea.vmem %s3990_s27, %s3513_s10 }
  0x60   : > { %s3569_s20 = scalar_lea.vmem %s3991_s21, %s2872_s22 }
  0x61   : > { %v2974_v0 = vld [vmem:[%s716_s25] sm:$0xff]   ;;  %v3316_v3 = vmov 128.0  }
  0x62   : > { %v2975_v1 = vunpack.c.l.bf16 %v2974_v0  ;;  %v2976_v2 = vunpack.c.h.bf16 %v2974_v0  ;;  %3080 = vrcp.f32 %v3316_v3  ;;  %v3078_v36 = vld [vmem:[%s3992_s9] ss:$0 sm:$0xff] }
  0x63   : > { %v3079_v40 = vld [vmem:[%s3993_s0] ss:$0 sm:$0xff] }
  0x64   : > { %769 = vadd.xlane.f32.xlu0 %v2975_v1 }
  0x68   : > { %v3081_v4 = vpop.eup %3080 }
  0x69   : > { %v774_v5 = vmul.f32 128.0, %v3081_v4  ;;  %vm778_vm0 = vweird.f32 %v3081_v4 }
  0x6b   : > { %v775_v6 = vsub.f32 1.0, %v774_v5 }
  0x6c   : > { %771 = vadd.xlane.f32.xlu0 %v2976_v2 }
  0x6d   : > { %v776_v7 = vmul.f32 %v3081_v4, %v775_v6 }
  0x6f   : > { %v777_v8 = vadd.f32 %v3081_v4, %v776_v7 }
  0x71   : > { %v779_v9 = vsel %vm778_vm0, %v3081_v4, %v777_v8 }
  0xd7   : > { %v770_v10 = vpop.xlane.xlu0 %769 }
  0xd8   : > { %v780_v11 = vmul.f32 %v779_v9, %v770_v10 }
  0xda   : > { %v782_v12 = vsub.f32 %v2975_v1, %v780_v11 }
  0xdc   : > { %v784_v13 = vmul.f32 %v782_v12, %v782_v12 }
  0xde   : > { %786 = vadd.xlane.f32.xlu1 %v784_v13 }
  0xdf   : > { %v772_v14 = vpop.xlane.xlu0 %771 }
  0xe0   : > { %v781_v15 = vmul.f32 %v779_v9, %v772_v14 }
  0xe2   : > { %v783_v16 = vsub.f32 %v2976_v2, %v781_v15 }
  0xe4   : > { %v785_v17 = vmul.f32 %v783_v16, %v783_v16 }
  0xe6   : > { %788 = vadd.xlane.f32.xlu1 %v785_v17 }
 0x151   : > { %v787_v18 = vpop.xlane.xlu1 %786 }
 0x152   : > { %v790_v19 = vmul.f32 %v787_v18, %v779_v9 }
 0x154   : > { %v792_v20 = vadd.f32 1e-12, %v790_v19 }
 0x156   : > { %3082 = vrsqrt.f32 %v792_v20  ;;  %vm800_vm2 = vweird.f32 %v792_v20 }
 0x159   : > { %v789_v21 = vpop.xlane.xlu1 %788 }
 0x15a   : > { %v791_v22 = vmul.f32 %v789_v21, %v779_v9 }
 0x15c   : > { %v3083_v23 = vpop.eup %3082  ;;  %v793_v24 = vadd.f32 1e-12, %v791_v22 }
 0x15d   : > { %v795_v25 = vmul.f32 %v3083_v23, %v792_v20  ;;  %vm801_vm1 = vweird.f32 %v3083_v23 }
 0x15e   : > { %3084 = vrsqrt.f32 %v793_v24  ;;  %vm802_vm3 = vmor %vm800_vm2, %vm801_vm1  ;;  %vm810_vm5 = vweird.f32 %v793_v24 }
 0x15f   : > { %v796_v26 = vmul.f32 %v3083_v23, %v795_v25 }
 0x161   : > { %v797_v27 = vmul.f32 0.5, %v796_v26 }
 0x163   : > { %v798_v28 = vsub.f32 1.5, %v797_v27 }
 0x164   : > { %v3085_v29 = vpop.eup %3084 }
 0x165   : > { %v799_v30 = vmul.f32 %v3083_v23, %v798_v28  ;;  %v805_v31 = vmul.f32 %v3085_v29, %v793_v24  ;;  %vm811_vm4 = vweird.f32 %v3085_v29 }
 0x166   : > { %vm812_vm6 = vmor %vm810_vm5, %vm811_vm4 }
 0x167   : > { %v806_v32 = vmul.f32 %v3085_v29, %v805_v31  ;;  %v803_v33 = vsel %vm802_vm3, %v3083_v23, %v799_v30 }
 0x168   : > { %v814_v37 = vmul.f32 %v803_v33, %v782_v12 }
 0x169   : > { %v807_v34 = vmul.f32 0.5, %v806_v32 }
 0x16a   : > { %v819_v41 = vmul.f32 %v3078_v36, %v814_v37 }
 0x16b   : > { %v808_v35 = vsub.f32 1.5, %v807_v34 }
 0x16c   : > { %v824_v44 = vadd.f32 %v3079_v40, %v819_v41 }
 0x16d   : > { %v809_v38 = vmul.f32 %v3085_v29, %v808_v35 }
 0x16f   : > { %v813_v39 = vsel %vm812_vm6, %v3085_v29, %v809_v38 }
 0x170   : > { %v815_v42 = vmul.f32 %v813_v39, %v783_v16 }
 0x172   : > { %v820_v43 = vmul.f32 %v3078_v36, %v815_v42 }
 0x174   : > { %v825_v45 = vadd.f32 %v3079_v40, %v820_v43 }
 0x176   : > { %v2980_v46 = vpack.c.bf16 %v825_v45, %v824_v44 }
 0x178   : > { %2981 = vst [vmem:[%s3569_s20] sm:$0xff] %v2980_v46  }
 0x179 PF: > { %v2563_v47 = vld [vmem:[%s3497_s14 + $0xa8] sm:$0xf]  ;;  %v2899_v48 = vld [vmem:[%s3497_s14 + $0xb0] sm:$0xf0]  ;;  %v2898_v49 = vld [vmem:[%s3497_s14 + $0xac] sm:$0xf] }
 0x17a   : > { %v2564_v50 = vor.u32 %v2899_v48, %v2563_v47  ;;  %v2565_v51 = vld [vmem:[%s3497_s14 + $0xb4] sm:$0xf0]  ;;  %v2551_v52 = vld [vmem:[%s3497_s14 + $0x90] sm:$0xf]  ;;  %v2896_v53 = vld [vmem:[%s3497_s14 + $0x98] sm:$0xf0] }
 0x17b   : > { %v2568_v54 = vor.u32 %v2898_v49, %v2565_v51  ;;  %v2895_v55 = vld [vmem:[%s3497_s14 + $0x94] sm:$0xf]  ;;  %v2553_v56 = vld [vmem:[%s3497_s14 + $0x9c] sm:$0xf0]  ;;  %v2552_v57 = vor.u32 %v2896_v53, %v2551_v52  ;;  %v2539_v59 = vld [vmem:[%s3497_s14 + $0x78] sm:$0xf] }
 0x17c   : > { %1012 = vmatpush.bf16.msra.mxu0 %v2564_v50  ;;  %v2556_v58 = vor.u32 %v2895_v55, %v2553_v56  ;;  %v2893_v60 = vld [vmem:[%s3497_s14 + $0x80] sm:$0xf0]  ;;  %v2892_v61 = vld [vmem:[%s3497_s14 + $0x7c] sm:$0xf]  ;;  %v2541_v62 = vld [vmem:[%s3497_s14 + $0x84] sm:$0xf0] }
 0x17d   : > { %1026 = vmatpush.bf16.msra.mxu1 %v2568_v54  ;;  %v2540_v63 = vor.u32 %v2893_v60, %v2539_v59  ;;  %v2544_v0 = vor.u32 %v2892_v61, %v2541_v62  ;;  %v2527_v1 = vld [vmem:[%s3497_s14 + $0x60] sm:$0xf]  ;;  %v2890_v2 = vld [vmem:[%s3497_s14 + $0x68] sm:$0xf0]  ;;  %v2889_v3 = vld [vmem:[%s3497_s14 + $0x64] sm:$0xf] }
 0x17e   : > { %v2529_v4 = vld [vmem:[%s3497_s14 + $0x6c] sm:$0xf0]  ;;  %v2528_v5 = vor.u32 %v2890_v2, %v2527_v1  ;;  %v2900_v7 = vld [vmem:[%s3497_s14 + $0xb8] sm:$0xf0]  ;;  %v2559_v8 = vld [vmem:[%s3497_s14 + $0x98] sm:$0xf] }
 0x17f   : > { %v2571_v6 = vld [vmem:[%s3497_s14 + $0xb0] sm:$0xf]  ;;  %v2532_v9 = vor.u32 %v2889_v3, %v2529_v4  ;;  %v2515_v10 = vld [vmem:[%s3497_s14 + $0x48] sm:$0xf]  ;;  %v2887_v11 = vld [vmem:[%s3497_s14 + $0x50] sm:$0xf0] }
 0x180   : > { %1013 = vmatpush.bf16.msra.mxu0 %v2552_v57  ;;  %v2572_v12 = vor.u32 %v2900_v7, %v2571_v6  ;;  %v2897_v13 = vld [vmem:[%s3497_s14 + $0xa0] sm:$0xf0]  ;;  %v2886_v14 = vld [vmem:[%s3497_s14 + $0x4c] sm:$0xf]  ;;  %v2517_v15 = vld [vmem:[%s3497_s14 + $0x54] sm:$0xf0]  ;;  %v2516_v17 = vor.u32 %v2887_v11, %v2515_v10 }
 0x181   : > { %1027 = vmatpush.bf16.msra.mxu1 %v2556_v58  ;;  %v2560_v16 = vor.u32 %v2897_v13, %v2559_v8  ;;  %v2503_v18 = vld [vmem:[%s3497_s14 + $0x30] sm:$0xf]  ;;  %v2547_v19 = vld [vmem:[%s3497_s14 + $0x80] sm:$0xf]  ;;  %v2894_v20 = vld [vmem:[%s3497_s14 + $0x88] sm:$0xf0]  ;;  %v2520_v21 = vor.u32 %v2886_v14, %v2517_v15 }
 0x182   : > { %1040 = vmatpush.bf16.msra.mxu2 %v2572_v12  ;;  %v2884_v22 = vld [vmem:[%s3497_s14 + $0x38] sm:$0xf0]  ;;  %v2883_v23 = vld [vmem:[%s3497_s14 + $0x34] sm:$0xf]  ;;  %v2505_v24 = vld [vmem:[%s3497_s14 + $0x3c] sm:$0xf0]  ;;  %v2548_v25 = vor.u32 %v2894_v20, %v2547_v19 }
 0x183   : > { %v2504_v26 = vor.u32 %v2884_v22, %v2503_v18  ;;  %v2535_v27 = vld [vmem:[%s3497_s14 + $0x68] sm:$0xf]  ;;  %v2891_v28 = vld [vmem:[%s3497_s14 + $0x70] sm:$0xf0]  ;;  %v2508_v29 = vor.u32 %v2883_v23, %v2505_v24  ;;  %v2491_v30 = vld [vmem:[%s3497_s14 + $0x18] sm:$0xf]  ;;  %v833_v24 = vlaneseq }
 0x184   : > { %1014 = vmatpush.bf16.msra.mxu0 %v2540_v63  ;;  %v2881_v31 = vld [vmem:[%s3497_s14 + $0x20] sm:$0xf0]  ;;  %v2880_v32 = vld [vmem:[%s3497_s14 + $0x1c] sm:$0xf]  ;;  %v2493_v33 = vld [vmem:[%s3497_s14 + $0x24] sm:$0xf0]  ;;  %v2536_v34 = vor.u32 %v2891_v28, %v2535_v27 }
 0x185   : > { %1028 = vmatpush.bf16.msra.mxu1 %v2544_v0  ;;  %v2492_v35 = vor.u32 %v2881_v31, %v2491_v30  ;;  %v2523_v36 = vld [vmem:[%s3497_s14 + $0x50] sm:$0xf]  ;;  %v2888_v37 = vld [vmem:[%s3497_s14 + $0x58] sm:$0xf0]  ;;  %v2496_v38 = vor.u32 %v2880_v32, %v2493_v33  ;;  %v2479_v39 = vld [vmem:[%s3497_s14] sm:$0xf] }
 0x186   : > { %1041 = vmatpush.bf16.msra.mxu2 %v2560_v16  ;;  %v2878_v40 = vld [vmem:[%s3497_s14 + $0x8] sm:$0xf0]  ;;  %v2877_v41 = vld [vmem:[%s3497_s14 + $0x4] sm:$0xf]  ;;  %v2481_v42 = vld [vmem:[%s3497_s14 + $0xc] sm:$0xf0]  ;;  %v2524_v43 = vor.u32 %v2888_v37, %v2523_v36 }
 0x187   : > { %v2480_v44 = vor.u32 %v2878_v40, %v2479_v39  ;;  %v2511_v45 = vld [vmem:[%s3497_s14 + $0x38] sm:$0xf]  ;;  %v2885_v46 = vld [vmem:[%s3497_s14 + $0x40] sm:$0xf0]  ;;  %v2484_v47 = vor.u32 %v2877_v41, %v2481_v42  ;;  %v2499_v50 = vld [vmem:[%s3497_s14 + $0x20] sm:$0xf] }
 0x188   : > { %1015 = vmatpush.bf16.msra.mxu0 %v2528_v5  ;;  %v2876_v48 = vld [vmem:[%s3569_s20] sm:$0xff]  ;;  %v2512_v49 = vor.u32 %v2885_v46, %v2511_v45  ;;  %v2882_v51 = vld [vmem:[%s3497_s14 + $0x28] sm:$0xf0]  ;;  %v2487_v53 = vld [vmem:[%s3497_s14 + $0x8] sm:$0xf]  ;;  %vm1066_vm7 = vcmask 261120  }
 0x189   : > { %1029 = vmatpush.bf16.msra.mxu1 %v2532_v9  ;;  %v2500_v52 = vor.u32 %v2882_v51, %v2499_v50  ;;  %v2879_v54 = vld [vmem:[%s3497_s14 + $0x10] sm:$0xf0]  ;;  %v870_v56 = vld [vmem:[%s3527_s15] sm:$0x7]  ;;  %s3317_s14 = smov 96   ;;  %s3318_s27 = smov 64  }
 0x18a   : > { %1042 = vmatpush.bf16.msra.mxu2 %v2548_v25  ;;  %v2488_v55 = vor.u32 %v2879_v54, %v2487_v53  ;;  %v872_v59 = vperm.slane %v870_v56, 0  ;;  %v873_v60 = vperm.slane %v870_v56, 1  ;;  %v874_v8 = vperm.slane %v870_v56, 2  ;;  %s3319_s22 = smov 32   ;;  %s832_s25 = sld [smem:[#allocation3 + %s3297_s29]] }
 0x18b   : > { %v834_v25 = vand.u32 127, %v833_v24  ;;  %v3320_v28 = vmov -1e+09   ;;  %vm1091_vm9 = vcmask 130048   ;;  %vm1377_vm10 = vcmask 523264   ;;  %s3997_s16 = sld [smem:[#allocation19_spill]] }
 0x18c   : > { %1016 = vmatpush.bf16.msra.mxu0 %v2516_v17  ;;  %vm1380_vm11 = vcmask 785408   ;;  %s3998_s1 = sld [smem:[#allocation28_spill]] }
 0x18d   : > { %1030 = vmatpush.bf16.msra.mxu1 %v2520_v21 }
 0x18e   : > { %1043 = vmatpush.bf16.msra.mxu2 %v2536_v34 }
 0x190   : > { %1017 = vmatpush.bf16.msra.mxu0 %v2504_v26  ;;  %v835_v26 = vstv %s832_s25 }
 0x191   : > { %1031 = vmatpush.bf16.msra.mxu1 %v2508_v29  ;;  %vm836_vm8 = vcmp.lt.s32.totalorder %v834_v25, %v835_v26 }
 0x192   : > { %1044 = vmatpush.bf16.msra.mxu2 %v2524_v43  ;;  %v3644_v29 = vsel %vm836_vm8, 0.0, %v3320_v28  ;;  %s3999_s26 = scalar_lea.vmem %s3998_s1, %s3513_s10 }
 0x194   : > { %1018 = vmatpush.bf16.msra.mxu0 %v2492_v35 }
 0x195   : > { %1032 = vmatpush.bf16.msra.mxu1 %v2496_v38 }
 0x196   : > { %1045 = vmatpush.bf16.msra.mxu2 %v2512_v49 }
 0x198   : > { %1019 = vmatpush.bf16.msra.mxu0 %v2480_v44 }
 0x199   : > { %1033 = vmatpush.bf16.msra.mxu1 %v2484_v47 }
 0x19a   : > { %1046 = vmatpush.bf16.msra.mxu2 %v2500_v52 }
 0x19b   : > { %1020 = vmatmul.bf16.vlgmr.msra.gmra.mxu0 %v2876_v48 }
 0x19c   : > { %1034 = vmatmul.bf16.vlgmr.msra.gmra.mxu1 %v2876_v48 }
 0x19e   : > { %1047 = vmatpush.bf16.msra.mxu2 %v2488_v55 }
 0x1a1   : > { %1048 = vmatmul.bf16.vlgmr.msra.gmra.mxu2 %v2876_v48 }
 0x218   : > { %v1021_v57 = vpop.f32.mrf.mxu0 }
 0x219   : > { %v1035_v58 = vpop.f32.mrf.mxu1  ;;  %v1022_v61 = vadd.f32 %v1021_v57, %v872_v59 }
 0x21a   : > { %v1036_v62 = vadd.f32 %v1035_v58, %v873_v60 }
 0x21c   : > { %v1054_v2 = vpack.c.bf16 %v1036_v62, %v1022_v61 }
 0x21e   : > { %v1063_v5 = vunpack.c.h.b16 %v1054_v2  ;;  %v1060_v13 = vunpack.c.l.b16 %v1054_v2 }
 0x220   : > { %v1023_v63 = vpop.f32.mrf.mxu0 }
 0x221   : > { %v1024_v0 = vadd.f32 %v1023_v63, %v872_v59  ;;  %v1037_v1 = vpop.f32.mrf.mxu1 }
 0x222   : > { %v1038_v3 = vadd.f32 %v1037_v1, %v873_v60 }
 0x224   : > { %v1056_v4 = vpack.c.bf16 %v1038_v3, %v1024_v0  ;;  %v1049_v9 = vpop.f32.mrf.mxu2 }
 0x225   : > { %v1050_v12 = vadd.f32 %v1049_v9, %v874_v8 }
 0x226   : > { %v1064_v6 = vunpack.c.h.b16 %v1056_v4  ;;  %v1061_v11 = vunpack.c.l.b16 %v1056_v4 }
 0x227   : > { %v1055_v15 = vpack.c.bf16 %v1050_v12, %v1050_v12 }
 0x228   : > { %v3629_v7 = vpack.c.b16 %v1064_v6, %v1063_v5  ;;  %v1062_v14 = vpack.c.b16 %v1061_v11, %v1060_v13 }
 0x229   : > { %v1117_v18 = vunpack.c.l.b16 %v1055_v15 }
 0x22a   : > { %1140 = vrot.lane.b32.xlu2 %v3629_v7, %s3317_s14  ;;  %v1071_v10 = vsel %vm1066_vm7, %v3629_v7, 0 }
 0x22b   : > { %1080 = vmatpush.bf16.xpose.msra.mxu3 %v1071_v10 }
 0x22c   : > { %v1051_v16 = vpop.f32.mrf.mxu2 }
 0x22d   : > { %v1052_v17 = vadd.f32 %v1051_v16, %v874_v8 }
 0x22f   : > { %v1057_v19 = vpack.c.bf16 %v1052_v17, %v1052_v17 }
 0x231   : > { %v1118_v20 = vunpack.c.l.b16 %v1057_v19 }
 0x232   : > { %1138 = vrot.lane.b32.xlu2 %v1062_v14, %s3317_s14  ;;  %2573 = vmatmul.msk.bf16.vlgmr.msra.gmra.mxu3 %vm1066_vm7, %v1062_v14 }
 0x233   : > { %v3637_v21 = vpack.c.b16 %v1118_v20, %v1117_v18 }
 0x235   : > { %1131 = vmatpush.bf16.msrb.mxu3 %v3637_v21 }
 0x23a   : > { %1209 = vrot.lane.b32.xlu2 %v1062_v14, %s3318_s27 }
 0x242   : > { %1280 = vrot.lane.b32.xlu2 %v1062_v14, %s3319_s22 }
 0x284   : > { %v1141_v22 = vpop.permute.xlu2 %1140 }
 0x285   : > { %v1146_v23 = vsel %vm1066_vm7, %v1141_v22, 0 }
 0x286   : > { %1155 = vmatpush.bf16.xpose.msra.mxu3 %v1146_v23 }
 0x28c   : > { %v1139_v47 = vpop.permute.xlu2 %1138 }
 0x294   : > { %v1210_v50 = vpop.permute.xlu2 %1209 }
 0x29c   : > { %v1281_v0 = vpop.permute.xlu2 %1280 }
 0x2b5   : > { %v1082_v27 = vpop.f32.mrf.mxu3 }
 0x2b6   : > { %v1087_v30 = vmul.f32 0.17677669, %v1082_v27 }
 0x2b8   : > { %v1089_v31 = vadd.f32 %v1087_v30, %v3644_v29 }
 0x2ba   : > { %v1092_v32 = vsel %vm1091_vm9, %v1089_v31, -inf }
 0x2bb   : > { %1093 = vmax.xlane.f32.xlu0 %v1092_v32 }
 0x2bd   : > { %v1084_v33 = vpop.f32.mrf.mxu3 }
 0x2be   : > { %v1088_v34 = vmul.f32 0.17677669, %v1084_v33 }
 0x2c0   : > { %v1090_v35 = vadd.f32 %v1088_v34, %v3644_v29 }
 0x2c2   : > { %v1095_v36 = vsel %vm1091_vm9, %v1090_v35, -inf }
 0x2c3   : > { %1096 = vmax.xlane.f32.xlu0 %v1095_v36 }
 0x2d7   : > { %1211 = vrot.lane.b32.xlu0 %v3629_v7, %s3318_s27 }
 0x32e   : > { %v1094_v37 = vpop.xlane.xlu0 %1093 }
 0x32f   : > { %v1098_v38 = vsub.f32 %v1089_v31, %v1094_v37 }
 0x331   : > { %v1100_v39 = vmul.f32 1.442695, %v1098_v38 }
 0x333   : > { %3107 = vpow2.f32 %v1100_v39 }
 0x336   : > { %v1097_v40 = vpop.xlane.xlu0 %1096 }
 0x337   : > { %v1099_v41 = vsub.f32 %v1090_v35, %v1097_v40 }
 0x339   : > { %v3108_v42 = vpop.eup %3107  ;;  %v1102_v43 = vmul.f32 1.442695, %v1099_v41 }
 0x33a   : > { %v1104_v44 = vsel %vm1091_vm9, %v3108_v42, 0.0 }
 0x33b   : > { %3109 = vpow2.f32 %v1102_v43  ;;  %1105 = vadd.xlane.f32.xlu1 %v1104_v44 }
 0x341   : > { %v3110_v45 = vpop.eup %3109 }
 0x342   : > { %v1107_v46 = vsel %vm1091_vm9, %v3110_v45, 0.0 }
 0x343   : > { %1108 = vadd.xlane.f32.xlu1 %v1107_v46 }
 0x349   : > { %v1212_v48 = vpop.permute.xlu0 %1211 }
 0x34a   : > { %v1217_v49 = vsel %vm1066_vm7, %v1212_v48, 0 }
 0x34b   : > { %1226 = vmatpush.bf16.xpose.msrb.mxu2 %v1217_v49 }
 0x352   : > { %2577 = vmatmul.msk.bf16.vlgmr.msrb.gmra.mxu2 %vm1066_vm7, %v1210_v50 }
 0x35c   : > { %1282 = vrot.lane.b32.xlu1 %v3629_v7, %s3319_s22 }
 0x3ae   : > { %v1106_v51 = vpop.xlane.xlu1 %1105 }
 0x3af   : > { %3111 = vrcp.f32 %v1106_v51 }
 0x3b5   : > { %v3112_v53 = vpop.eup %3111 }
 0x3b6   : > { %v1109_v52 = vpop.xlane.xlu1 %1108  ;;  %v1112_v55 = vmul.f32 %v3112_v53, %v3108_v42 }
 0x3b7   : > { %3113 = vrcp.f32 %v1109_v52 }
 0x3bd   : > { %v3114_v54 = vpop.eup %3113 }
 0x3be   : > { %v1113_v56 = vmul.f32 %v3114_v54, %v3110_v45 }
 0x3c0   : > { %v1114_v57 = vpack.c.bf16 %v1113_v56, %v1112_v55 }
 0x3c2   : > { %2574 = vmatmul.msk.bf16.vlgmr.msrb.gmra.mxu3 %vm1091_vm9, %v1114_v57 }
 0x3ce   : > { %v1283_v58 = vpop.permute.xlu1 %1282 }
 0x3cf   : > { %v1288_v59 = vsel %vm1066_vm7, %v1283_v58, 0 }
 0x3d0   : > { %1297 = vmatpush.bf16.xpose.msrb.mxu3 %v1288_v59 }
 0x3d2   : > { %2575 = vmatmul.msk.bf16.vlgmr.msra.gmra.mxu3 %vm1066_vm7, %v1139_v47 }
 0x3d5   : > { %v1228_v60 = vpop.f32.mrf.mxu2 }
 0x3d6   : > { %v1233_v61 = vmul.f32 0.17677669, %v1228_v60 }
 0x3d8   : > { %v1235_v62 = vadd.f32 %v1233_v61, %v3644_v29 }
 0x3da   : > { %v1237_v63 = vsel %vm1091_vm9, %v1235_v62, -inf }
 0x3db   : > { %1238 = vmax.xlane.f32.xlu1 %v1237_v63 }
 0x3dd   : > { %v1230_v8 = vpop.f32.mrf.mxu2 }
 0x3de   : > { %v1234_v11 = vmul.f32 0.17677669, %v1230_v8 }
 0x3e0   : > { %v1236_v16 = vadd.f32 %v1234_v11, %v3644_v29 }
 0x3e2   : > { %2579 = vmatmul.msk.bf16.vlgmr.msrb.gmra.mxu3 %vm1066_vm7, %v1281_v0  ;;  %v1240_v19 = vsel %vm1091_vm9, %v1236_v16, -inf }
 0x445   : > { %v3664_v1 = vpop.f32.mrf.mxu3 }
 0x44d   : > { %v3666_v2 = vpop.f32.mrf.mxu3 }
 0x44e   : > { %v1239_v3 = vpop.xlane.xlu1 %1238 }
 0x44f   : > { %v1243_v4 = vsub.f32 %v1235_v62, %v1239_v3 }
 0x451   : > { %v1245_v5 = vmul.f32 1.442695, %v1243_v4 }
 0x453   : > { %3115 = vpow2.f32 %v1245_v5 }
 0x455   : > { %v1157_v6 = vpop.f32.mrf.mxu3 }
 0x456   : > { %v1162_v7 = vmul.f32 0.17677669, %v1157_v6 }
 0x458   : > { %v1164_v9 = vadd.f32 %v1162_v7, %v3644_v29 }
 0x459   : > { %v3669_v10 = vpop.eup %3115 }
 0x45a   : > { %v1166_v12 = vsel %vm1091_vm9, %v1164_v9, -inf  ;;  %v1249_v13 = vsel %vm1091_vm9, %v3669_v10, 0.0 }
 0x45b   : > { %1167 = vmax.xlane.f32.xlu2 %v1166_v12  ;;  %1250 = vadd.xlane.f32.xlu1 %v1249_v13 }
 0x45d   : > { %v1159_v14 = vpop.f32.mrf.mxu3 }
 0x45e   : > { %v1163_v15 = vmul.f32 0.17677669, %v1159_v14 }
 0x460   : > { %v1165_v17 = vadd.f32 %v1163_v15, %v3644_v29 }
 0x462   : > { %v1169_v18 = vsel %vm1091_vm9, %v1165_v17, -inf }
 0x463   : > { %1170 = vmax.xlane.f32.xlu0 %v1169_v18  ;;  %1241 = vmax.xlane.f32.xlu2 %v1240_v19  ;;  %v2907_v18 = vld [vmem:[%s3532_s13 + $0x30] sm:$0xff] }
 0x465   : > { %v1299_v20 = vpop.f32.mrf.mxu3 }
 0x466   : > { %v1304_v22 = vmul.f32 0.17677669, %v1299_v20 }
 0x468   : > { %v1306_v23 = vadd.f32 %v1304_v22, %v3644_v29 }
 0x46a   : > { %v1308_v24 = vsel %vm1091_vm9, %v1306_v23, -inf }
 0x46b   : > { %1309 = vmax.xlane.f32.xlu0 %v1308_v24 }
 0x46d   : > { %v1301_v25 = vpop.f32.mrf.mxu3 }
 0x46e   : > { %v1305_v26 = vmul.f32 0.17677669, %v1301_v25 }
 0x470   : > { %v1307_v27 = vadd.f32 %v1305_v26, %v3644_v29 }
 0x472   : > { %v1311_v28 = vsel %vm1091_vm9, %v1307_v27, -inf }
 0x473   : > { %1312 = vmax.xlane.f32.xlu2 %v1311_v28  ;;  %v2905_v28 = vld [vmem:[%s3532_s13 + $0x20] sm:$0xff] }
 0x48b   : > { %1189 = vrot.lane.b32.xlu2 %v3637_v21, %s3317_s14 }
 0x4ce   : > { %v1168_v30 = vpop.xlane.xlu2 %1167  ;;  %v1251_v55 = vpop.xlane.xlu1 %1250 }
 0x4cf   : > { %v1172_v31 = vsub.f32 %v1164_v9, %v1168_v30  ;;  %v2904_v30 = vld [vmem:[%s3532_s13 + $0x18] sm:$0xff] }
 0x4d1   : > { %v1174_v32 = vmul.f32 1.442695, %v1172_v31  ;;  %v2903_v31 = vld [vmem:[%s3532_s13 + $0x10] sm:$0xff] }
 0x4d3   : > { %3117 = vpow2.f32 %v1174_v32  ;;  %v2902_v32 = vld [vmem:[%s3532_s13 + $0x8] sm:$0xff] }
 0x4d6   : > { %v1242_v33 = vpop.xlane.xlu2 %1241  ;;  %v1171_v34 = vpop.xlane.xlu0 %1170 }
 0x4d7   : > { %v1244_v35 = vsub.f32 %v1236_v16, %v1242_v33  ;;  %v1173_v38 = vsub.f32 %v1165_v17, %v1171_v34  ;;  %v2908_v17 = vld [vmem:[%s3532_s13 + $0x38] sm:$0xff]  ;;  %v2901_v33 = vld [vmem:[%s3532_s13] sm:$0xff] }
 0x4d8   : > { %1452 = vmatpush.bf16.msrb.mxu1 %v2908_v17 }
 0x4d9   : > { %v3118_v36 = vpop.eup %3117  ;;  %v1247_v37 = vmul.f32 1.442695, %v1244_v35  ;;  %v1176_v29 = vmul.f32 1.442695, %v1173_v38 }
 0x4da   : > { %v1178_v39 = vsel %vm1091_vm9, %v3118_v36, 0.0 }
 0x4db   : > { %3119 = vpow2.f32 %v1247_v37  ;;  %1179 = vadd.xlane.f32.xlu1 %v1178_v39 }
 0x4dc   : > { %3121 = vpow2.f32 %v1176_v29  ;;  %1453 = vmatpush.bf16.msrb.mxu1 %v2907_v18 }
 0x4de   : > { %v1310_v40 = vpop.xlane.xlu0 %1309 }
 0x4df   : > { %v1314_v41 = vsub.f32 %v1306_v23, %v1310_v40 }
 0x4e1   : > { %v3120_v42 = vpop.eup %3119  ;;  %v1316_v43 = vmul.f32 1.442695, %v1314_v41 }
 0x4e2   : > { %v1252_v44 = vsel %vm1091_vm9, %v3120_v42, 0.0  ;;  %v3122_v46 = vpop.eup %3121 }
 0x4e3   : > { %3123 = vpow2.f32 %v1316_v43  ;;  %1253 = vadd.xlane.f32.xlu0 %v1252_v44  ;;  %v1181_v50 = vsel %vm1091_vm9, %v3122_v46, 0.0 }
 0x4e6   : > { %v1313_v45 = vpop.xlane.xlu2 %1312 }
 0x4e7   : > { %v1315_v47 = vsub.f32 %v1307_v27, %v1313_v45 }
 0x4e9   : > { %v3124_v48 = vpop.eup %3123  ;;  %v1318_v49 = vmul.f32 1.442695, %v1315_v47 }
 0x4ea   : > { %v1320_v51 = vsel %vm1091_vm9, %v3124_v48, 0.0 }
 0x4eb   : > { %3125 = vpow2.f32 %v1318_v49  ;;  %1182 = vadd.xlane.f32.xlu0 %v1181_v50  ;;  %1321 = vadd.xlane.f32.xlu1 %v1320_v51  ;;  %v830_v49 = vld [vmem:[%s3569_s20] sm:$0xff]  }
 0x4ee   : > { %v1190_v52 = vpop.permute.xlu2 %1189 }
 0x4ef   : > { %1202 = vmatpush.bf16.msrb.mxu0 %v1190_v52 }
 0x4f1   : > { %v3126_v53 = vpop.eup %3125 }
 0x4f2   : > { %v1323_v54 = vsel %vm1091_vm9, %v3126_v53, 0.0 }
 0x4f3   : > { %1324 = vadd.xlane.f32.xlu0 %v1323_v54 }
 0x504   : > { %1260 = vrot.lane.b32.xlu1 %v3637_v21, %s3318_s27 }
 0x507   : > { %1331 = vrot.lane.b32.xlu0 %v3637_v21, %s3319_s22 }
 0x54e   : > { %v1180_v57 = vpop.xlane.xlu1 %1179 }
 0x54f   : > { %3127 = vrcp.f32 %v1180_v57  ;;  %v3321_v57 = vmov 128.0  }
 0x555   : > { %v3128_v59 = vpop.eup %3127 }
 0x556   : > { %v1254_v56 = vpop.xlane.xlu0 %1253  ;;  %v1186_v61 = vmul.f32 %v3128_v59, %v3118_v36 }
 0x55e   : > { %v1183_v58 = vpop.xlane.xlu0 %1182  ;;  %v1322_v3 = vpop.xlane.xlu1 %1321 }
 0x55f   : > { %3129 = vrcp.f32 %v1183_v58 }
 0x560   : > { %3131 = vrcp.f32 %v1254_v56 }
 0x561   : > { %3133 = vrcp.f32 %v1251_v55 }
 0x565   : > { %v3130_v60 = vpop.eup %3129 }
 0x566   : > { %v1187_v62 = vmul.f32 %v3130_v60, %v3122_v46  ;;  %v1325_v0 = vpop.xlane.xlu0 %1324  ;;  %v3132_v21 = vpop.eup %3131 }
 0x567   : > { %3135 = vrcp.f32 %v1325_v0  ;;  %v3134_v4 = vpop.eup %3133  ;;  %v1258_v6 = vmul.f32 %v3132_v21, %v3120_v42 }
 0x568   : > { %v1188_v63 = vpack.c.bf16 %v1187_v62, %v1186_v61  ;;  %3137 = vrcp.f32 %v1322_v3  ;;  %v1257_v8 = vmul.f32 %v3134_v4, %v3669_v10  ;;  %v2906_v10 = vld [vmem:[%s3532_s13 + $0x28] sm:$0xff]  ;;  %s3994_s13 = scalar_lea.vmem %s3934_s7, %s3513_s10 }
 0x569   : > { %1454 = vmatpush.bf16.msrb.mxu1 %v2906_v10  ;;  %3139 = vrcp.f32 %v3321_v57  ;;  %v2737_v10 = vld [vmem:[%s3547_s19 + $0xf8] sm:$0xf0]  ;;  %v2923_v57 = vld [vmem:[%s3547_s19 + $0x6c] sm:$0xf0] }
 0x56a   : > { %2576 = vmatmul.msk.bf16.vlgmr.msrb.gmra.mxu0 %vm1091_vm9, %v1188_v63  ;;  %v1259_v12 = vpack.c.bf16 %v1258_v6, %v1257_v8 }
 0x56d   : > { %v3136_v5 = vpop.eup %3135  ;;  %1455 = vmatpush.bf16.msrb.mxu1 %v2905_v28  ;;  %v2936_v28 = vld [vmem:[%s3547_s19 + $0xd4] sm:$0xf0] }
 0x56e   : > { %v3138_v7 = vpop.eup %3137  ;;  %v1329_v11 = vmul.f32 %v3136_v5, %v3126_v53  ;;  %v1467_v53 = vunpack.c.h.bf16 %v830_v49 }
 0x56f   : > { %v1328_v13 = vmul.f32 %v3138_v7, %v3124_v48  ;;  %v3140_v58 = vpop.eup %3139 }
 0x570   : > { %v1477_v59 = vmul.f32 128.0, %v3140_v58  ;;  %vm1481_vm12 = vweird.f32 %v3140_v58 }
 0x571   : > { %v1330_v15 = vpack.c.bf16 %v1329_v11, %v1328_v13  ;;  %1456 = vmatpush.bf16.msrb.mxu1 %v2904_v30  ;;  %v2939_v11 = vld [vmem:[%s3547_s19 + $0xec] sm:$0xf0] }
 0x572   : > { %v1478_v60 = vsub.f32 1.0, %v1477_v59 }
 0x574   : > { %v1479_v61 = vmul.f32 %v3140_v58, %v1478_v60  ;;  %v2665_v60 = vld [vmem:[%s3547_s19 + $0x70] sm:$0xf0] }
 0x575   : > { %1457 = vmatpush.bf16.msrb.mxu1 %v2903_v31 }
 0x576   : > { %v1261_v9 = vpop.permute.xlu1 %1260  ;;  %v1480_v62 = vadd.f32 %v3140_v58, %v1479_v61  ;;  %v2671_v61 = vld [vmem:[%s3547_s19 + $0x68] sm:$0xf] }
 0x577   : > { %1273 = vmatpush.bf16.msra.mxu2 %v1261_v9  ;;  %v2727_v9 = vld [vmem:[%s3547_s19 + $0xe0] sm:$0xf] }
 0x578   : > { %v3718_v63 = vsel %vm1481_vm12, %v3140_v58, %v1480_v62  ;;  %v2728_v13 = vor.u32 %v2939_v11, %v2727_v9  ;;  %v2921_v58 = vld [vmem:[%s3547_s19 + $0x64] sm:$0xf]  ;;  %v2924_v62 = vld [vmem:[%s3547_s19 + $0x74] sm:$0xf0]  ;;  %v2919_v9 = vld [vmem:[%s3547_s19 + $0x4c] sm:$0xf0] }
 0x579   : > { %v1332_v14 = vpop.permute.xlu0 %1331  ;;  %1458 = vmatpush.bf16.msrb.mxu1 %v2902_v32  ;;  %v2934_v32 = vld [vmem:[%s3547_s19 + $0xcc] sm:$0xf]  ;;  %v2917_v11 = vld [vmem:[%s3547_s19 + $0x44] sm:$0xf] }
 0x57a   : > { %2578 = vmatmul.msk.bf16.vlgmr.msra.gmra.mxu2 %vm1091_vm9, %v1259_v12  ;;  %1344 = vmatpush.bf16.msra.mxu0 %v1332_v14  ;;  %v2937_v12 = vld [vmem:[%s3547_s19 + $0xe4] sm:$0xf]  ;;  %v2729_v14 = vld [vmem:[%s3547_s19 + $0xf0] sm:$0xf0] }
 0x57b   : > { %v2732_v17 = vor.u32 %v2937_v12, %v2729_v14  ;;  %1732 = vmatpush.bf16.msrb.mxu2 %v2728_v13  ;;  %v2649_v13 = vld [vmem:[%s3547_s19 + $0x50] sm:$0xf0]  ;;  %v2655_v14 = vld [vmem:[%s3547_s19 + $0x48] sm:$0xf] }
 0x57d   : > { %2580 = vmatmul.msk.bf16.vlgmr.msra.gmra.mxu0 %vm1091_vm9, %v1330_v15  ;;  %1459 = vmatpush.bf16.msrb.mxu1 %v2901_v33  ;;  %v2735_v15 = vld [vmem:[%s3547_s19 + $0xe8] sm:$0xf]  ;;  %v2721_v33 = vld [vmem:[%s3547_s19 + $0xd8] sm:$0xf0] }
 0x57e   : > { %1746 = vmatpush.bf16.msra.mxu3 %v2732_v17 }
 0x5e7   : > { %v1204_v16 = vpop.f32.mrf.mxu0 }
 0x5ef   : > { %v1206_v20 = vpop.f32.mrf.mxu0 }
 0x5f0   : > { %v3091_v25 = vpack.i.bf16 %v1206_v20, %v1204_v16  ;;  %v2940_v16 = vld [vmem:[%s3547_s19 + $0xf4] sm:$0xf0] }
 0x5f1   : > { %v2736_v18 = vor.u32 %v2940_v16, %v2735_v15  ;;  %v2920_v15 = vld [vmem:[%s3547_s19 + $0x54] sm:$0xf0]  ;;  %v2652_v16 = vor.u32 %v2917_v11, %v2649_v13  ;;  %v2963_v13 = vld [vmem:[%s3997_s16 + $0xb0] sm:$0xff] }
 0x5f2   : > { %v2656_v17 = vor.u32 %v2920_v15, %v2655_v14  ;;  %v2971_v14 = vld [vmem:[%s3997_s16 + $0xf0] sm:$0xff]  ;;  %v2948_v15 = vld [vmem:[%s3997_s16 + $0x38] sm:$0xff] }
 0x5f3   : > { %1760 = vmatpush.bf16.msrb.mxu0 %v2736_v18  ;;  %v2918_v18 = vld [vmem:[%s3547_s19 + $0x4c] sm:$0xf] }
 0x5fa   : > { %v1346_v24 = vpop.f32.mrf.mxu0 }
 0x5fd   : > { %v1275_v19 = vpop.f32.mrf.mxu2 }
 0x602   : > { %v1348_v26 = vpop.f32.mrf.mxu0 }
 0x603   : > { %v3096_v27 = vpack.i.bf16 %v1348_v26, %v1346_v24  ;;  %v2933_v24 = vld [vmem:[%s3547_s19 + $0xc4] sm:$0xf]  ;;  %v2713_v26 = vld [vmem:[%s3547_s19 + $0xd0] sm:$0xf0] }
 0x604   : > { %v2716_v30 = vor.u32 %v2933_v24, %v2713_v26  ;;  %v2639_v26 = vld [vmem:[%s3547_s19 + $0x28] sm:$0xf] }
 0x605   : > { %v1277_v22 = vpop.f32.mrf.mxu2 }
 0x606   : > { %v3086_v23 = vpack.i.bf16 %v1277_v22, %v1275_v19  ;;  %v2938_v19 = vld [vmem:[%s3547_s19 + $0xec] sm:$0xf]  ;;  %v2711_v22 = vld [vmem:[%s3547_s19 + $0xc0] sm:$0xf]  ;;  %1747 = vmatpush.bf16.msra.mxu3 %v2716_v30 }
 0x607   : > { %v2740_v20 = vor.u32 %v2938_v19, %v2737_v10  ;;  %v2657_v19 = vld [vmem:[%s3547_s19 + $0x58] sm:$0xf0] }
 0x608   : > { %3087 = vrot.lane.b32.xlu2 %v3086_v23, %s3318_s27  ;;  %v2935_v23 = vld [vmem:[%s3547_s19 + $0xcc] sm:$0xf0]  ;;  %v2660_v10 = vor.u32 %v2918_v18, %v2657_v19  ;;  %v2970_v18 = vld [vmem:[%s3997_s16 + $0xe8] sm:$0xff] }
 0x609   : > { %1774 = vmatpush.bf16.msra.mxu1 %v2740_v20  ;;  %v2631_v20 = vld [vmem:[%s3547_s19 + $0x20] sm:$0xf]  ;;  %v2947_v19 = vld [vmem:[%s3997_s16 + $0x30] sm:$0xff] }
 0x610   : > { %3092 = vrot.lane.b32.xlu2 %v3091_v25, %s3319_s22  ;;  %v2712_v25 = vor.u32 %v2935_v23, %v2711_v22  ;;  %v2915_v22 = vld [vmem:[%s3547_s19 + $0x2c] sm:$0xf0]  ;;  %v2913_v23 = vld [vmem:[%s3547_s19 + $0x24] sm:$0xf] }
 0x611   : > { %v2632_v24 = vor.u32 %v2915_v22, %v2631_v20  ;;  %v2961_v20 = vld [vmem:[%s3997_s16 + $0xa0] sm:$0xff] }
 0x612   : > { %1733 = vmatpush.bf16.msrb.mxu2 %v2712_v25  ;;  %v2633_v25 = vld [vmem:[%s3547_s19 + $0x30] sm:$0xf0]  ;;  %v2969_v22 = vld [vmem:[%s3997_s16 + $0xe0] sm:$0xff] }
 0x613   : > { %v2636_v30 = vor.u32 %v2913_v23, %v2633_v25  ;;  %v2946_v23 = vld [vmem:[%s3997_s16 + $0x28] sm:$0xff]  ;;  %v2960_v25 = vld [vmem:[%s3997_s16 + $0x98] sm:$0xff] }
 0x618   : > { %3097 = vrot.lane.b32.xlu2 %v3096_v27, %s3317_s14  ;;  %v2719_v27 = vld [vmem:[%s3547_s19 + $0xc8] sm:$0xf] }
 0x619   : > { %v2720_v31 = vor.u32 %v2936_v28, %v2719_v27  ;;  %v2916_v27 = vld [vmem:[%s3547_s19 + $0x34] sm:$0xf0] }
 0x61b   : > { %1761 = vmatpush.bf16.msrb.mxu0 %v2720_v31  ;;  %v2640_v31 = vor.u32 %v2916_v27, %v2639_v26  ;;  %v2968_v26 = vld [vmem:[%s3997_s16 + $0xd8] sm:$0xff]  ;;  %v2945_v27 = vld [vmem:[%s3997_s16 + $0x20] sm:$0xff] }
 0x662   : > { %v3088_v34 = vpop.permute.xlu2 %3087 }
 0x663   : > { %v3090_v29 = vunpack.i.h.bf16 %v3088_v34  ;;  %v3089_v40 = vunpack.i.l.bf16 %v3088_v34  ;;  %v2724_v34 = vor.u32 %v2934_v32, %v2721_v33  ;;  %v2914_v32 = vld [vmem:[%s3547_s19 + $0x2c] sm:$0xf]  ;;  %v2641_v33 = vld [vmem:[%s3547_s19 + $0x38] sm:$0xf0] }
 0x665   : > { %1775 = vmatpush.bf16.msra.mxu1 %v2724_v34  ;;  %v2615_v34 = vld [vmem:[%s3547_s19] sm:$0xf] }
 0x66a   : > { %v3093_v35 = vpop.permute.xlu2 %3092 }
 0x66b   : > { %v3095_v36 = vunpack.i.h.bf16 %v3093_v35  ;;  %v3094_v37 = vunpack.i.l.bf16 %v3093_v35  ;;  %v2695_v35 = vld [vmem:[%s3547_s19 + $0xa0] sm:$0xf] }
 0x66d   : > { %v1376_v38 = vsel %vm1066_vm7, %v3666_v2, %v3095_v36  ;;  %v1375_v39 = vsel %vm1066_vm7, %v3664_v1, %v3094_v37  ;;  %v3101_v2 = vld [vmem:[%s3994_s13] ss:$0 sm:$0xff]  ;;  %v1466_v1 = vunpack.c.l.bf16 %v830_v49  ;;  %v2931_v36 = vld [vmem:[%s3547_s19 + $0xac] sm:$0xf0]  ;;  %v2929_v37 = vld [vmem:[%s3547_s19 + $0xa4] sm:$0xf] }
 0x66e   : > { %v1378_v44 = vsel %vm1377_vm10, %v1375_v39, %v3089_v40  ;;  %v1379_v45 = vsel %vm1377_vm10, %v1376_v38, %v3090_v29  ;;  %v2696_v38 = vor.u32 %v2931_v36, %v2695_v35  ;;  %v2697_v39 = vld [vmem:[%s3547_s19 + $0xb0] sm:$0xf0]  ;;  %v2703_v29 = vld [vmem:[%s3547_s19 + $0xa8] sm:$0xf]  ;;  %v2932_v40 = vld [vmem:[%s3547_s19 + $0xb4] sm:$0xf0]  ;;  %v2644_v36 = vor.u32 %v2914_v32, %v2641_v33 }
 0x66f   : > { %v2944_v32 = vld [vmem:[%s3997_s16 + $0x18] sm:$0xff] }
 0x670   : > { %1734 = vmatpush.bf16.msrb.mxu2 %v2696_v38  ;;  %v2909_v38 = vld [vmem:[%s3547_s19 + $0x4] sm:$0xf]  ;;  %v2952_v33 = vld [vmem:[%s3997_s16 + $0x58] sm:$0xff] }
 0x672   : > { %v3098_v41 = vpop.permute.xlu2 %3097 }
 0x673   : > { %v3100_v42 = vunpack.i.h.bf16 %v3098_v41  ;;  %v3099_v43 = vunpack.i.l.bf16 %v3098_v41  ;;  %v2700_v41 = vor.u32 %v2929_v37, %v2697_v39  ;;  %v2911_v37 = vld [vmem:[%s3547_s19 + $0xc] sm:$0xf0]  ;;  %v2617_v39 = vld [vmem:[%s3547_s19 + $0x10] sm:$0xf0] }
 0x675   : > { %v1381_v46 = vsel %vm1380_vm11, %v1378_v44, %v3099_v43  ;;  %v1382_v47 = vsel %vm1380_vm11, %v1379_v45, %v3100_v42  ;;  %v2704_v42 = vor.u32 %v2932_v40, %v2703_v29  ;;  %v2930_v43 = vld [vmem:[%s3547_s19 + $0xac] sm:$0xf]  ;;  %v2705_v44 = vld [vmem:[%s3547_s19 + $0xb8] sm:$0xf0]  ;;  %1748 = vmatpush.bf16.msra.mxu3 %v2700_v41  ;;  %v2616_v29 = vor.u32 %v2911_v37, %v2615_v34  ;;  %v2623_v41 = vld [vmem:[%s3547_s19 + $0x8] sm:$0xf] }
 0x676   : > { %v1383_v48 = vpack.c.bf16 %v1382_v47, %v1381_v46  ;;  %v2708_v45 = vor.u32 %v2930_v43, %v2705_v44  ;;  %v2679_v46 = vld [vmem:[%s3547_s19 + $0x80] sm:$0xf]  ;;  %v2927_v47 = vld [vmem:[%s3547_s19 + $0x8c] sm:$0xf0]  ;;  %v2620_v40 = vor.u32 %v2909_v38, %v2617_v39  ;;  %v2910_v43 = vld [vmem:[%s3547_s19 + $0xc] sm:$0xf] }
 0x677   : > { %1762 = vmatpush.bf16.msrb.mxu0 %v2704_v42  ;;  %v2680_v49 = vor.u32 %v2927_v47, %v2679_v46  ;;  %v2912_v42 = vld [vmem:[%s3547_s19 + $0x14] sm:$0xf0]  ;;  %v2625_v46 = vld [vmem:[%s3547_s19 + $0x18] sm:$0xf0]  ;;  %v2958_v34 = vld [vmem:[%s3997_s16 + $0x88] sm:$0xff] }
 0x678   : > { %1460 = vmatmul.bf16.vlgmr.msrb.gmra.mxu1 %v1383_v48  ;;  %v2925_v48 = vld [vmem:[%s3547_s19 + $0x84] sm:$0xf]  ;;  %v2628_v47 = vor.u32 %v2910_v43, %v2625_v46  ;;  %v2943_v37 = vld [vmem:[%s3997_s16 + $0x10] sm:$0xff]  ;;  %v2950_v43 = vld [vmem:[%s3997_s16 + $0x48] sm:$0xff] }
 0x679   : > { %1776 = vmatpush.bf16.msra.mxu1 %v2708_v45  ;;  %1735 = vmatpush.bf16.msrb.mxu2 %v2680_v49  ;;  %v2624_v45 = vor.u32 %v2912_v42, %v2623_v41  ;;  %v2951_v38 = vld [vmem:[%s3997_s16 + $0x50] sm:$0xff]  ;;  %v2957_v39 = vld [vmem:[%s3997_s16 + $0x80] sm:$0xff]  ;;  %v2942_v42 = vld [vmem:[%s3997_s16 + $0x8] sm:$0xff] }
 0x6f5   : > { %v1461_v50 = vpop.f32.mrf.mxu1 }
 0x6f6   : > { %v1462_v51 = vadd.f32 %v3101_v2, %v1461_v50  ;;  %v2928_v50 = vld [vmem:[%s3547_s19 + $0x94] sm:$0xf0] }
 0x6f8   : > { %v1468_v52 = vadd.f32 %v1466_v1, %v1462_v51  ;;  %v2687_v1 = vld [vmem:[%s3547_s19 + $0x88] sm:$0xf] }
 0x6fa   : > { %1472 = vadd.xlane.f32.xlu0 %v1468_v52 }
 0x6fd   : > { %v1463_v54 = vpop.f32.mrf.mxu1 }
 0x6fe   : > { %v1464_v55 = vadd.f32 %v3101_v2, %v1463_v54  ;;  %v2681_v2 = vld [vmem:[%s3547_s19 + $0x90] sm:$0xf0]  ;;  %v2689_v54 = vld [vmem:[%s3547_s19 + $0x98] sm:$0xf0] }
 0x6ff   : > { %v2684_v51 = vor.u32 %v2925_v48, %v2681_v2 }
 0x700   : > { %v1469_v56 = vadd.f32 %v1467_v53, %v1464_v55  ;;  %v2926_v53 = vld [vmem:[%s3547_s19 + $0x8c] sm:$0xf] }
 0x701   : > { %v2692_v55 = vor.u32 %v2926_v53, %v2689_v54  ;;  %1749 = vmatpush.bf16.msra.mxu3 %v2684_v51 }
 0x702   : > { %1474 = vadd.xlane.f32.xlu1 %v1469_v56 }
 0x703   : > { %1777 = vmatpush.bf16.msra.mxu1 %v2692_v55 }
 0x76d   : > { %v1473_v0 = vpop.xlane.xlu0 %1472 }
 0x76e   : > { %v1483_v3 = vmul.f32 %v3718_v63, %v1473_v0  ;;  %v2668_v0 = vor.u32 %v2921_v58, %v2665_v60 }
 0x770   : > { %v3721_v21 = vsub.f32 %v1468_v52, %v1483_v3  ;;  %v2688_v52 = vor.u32 %v2928_v50, %v2687_v1  ;;  %v2672_v3 = vor.u32 %v2924_v62, %v2671_v61  ;;  %1750 = vmatpush.bf16.msra.mxu3 %v2668_v0 }
 0x772   : > { %v1487_v4 = vmul.f32 %v3721_v21, %v3721_v21  ;;  %1763 = vmatpush.bf16.msrb.mxu0 %v2688_v52 }
 0x774   : > { %1489 = vadd.xlane.f32.xlu2 %v1487_v4  ;;  %v2922_v4 = vld [vmem:[%s3547_s19 + $0x6c] sm:$0xf]  ;;  %1751 = vmatpush.bf16.msra.mxu3 %v2652_v16  ;;  %v2956_v16 = vld [vmem:[%s3997_s16 + $0x78] sm:$0xff] }
 0x775   : > { %v1475_v5 = vpop.xlane.xlu1 %1474 }
 0x776   : > { %v1484_v6 = vmul.f32 %v3718_v63, %v1475_v5  ;;  %v2673_v5 = vld [vmem:[%s3547_s19 + $0x78] sm:$0xf0]  ;;  %1764 = vmatpush.bf16.msrb.mxu0 %v2672_v3 }
 0x778   : > { %v3726_v7 = vsub.f32 %v1469_v56, %v1484_v6  ;;  %v2663_v56 = vld [vmem:[%s3547_s19 + $0x60] sm:$0xf]  ;;  %v2676_v6 = vor.u32 %v2922_v4, %v2673_v5  ;;  %1752 = vmatpush.bf16.msra.mxu3 %v2636_v30  ;;  %v2959_v30 = vld [vmem:[%s3997_s16 + $0x90] sm:$0xff] }
 0x779   : > { %v2664_v59 = vor.u32 %v2923_v57, %v2663_v56 }
 0x77a   : > { %v1488_v8 = vmul.f32 %v3726_v7, %v3726_v7  ;;  %1778 = vmatpush.bf16.msra.mxu1 %v2676_v6  ;;  %1765 = vmatpush.bf16.msrb.mxu0 %v2656_v17  ;;  %v2962_v17 = vld [vmem:[%s3997_s16 + $0xa8] sm:$0xff] }
 0x77b   : > { %1736 = vmatpush.bf16.msrb.mxu2 %v2664_v59 }
 0x77c   : > { %1491 = vadd.xlane.f32.xlu0 %v1488_v8  ;;  %v2647_v8 = vld [vmem:[%s3547_s19 + $0x40] sm:$0xf]  ;;  %1753 = vmatpush.bf16.msra.mxu3 %v2620_v40  ;;  %s3995_s19 = sld [smem:[#allocation27_spill]] }
 0x77d   : > { %v2648_v12 = vor.u32 %v2919_v9, %v2647_v8 }
 0x77e   : > { %1779 = vmatpush.bf16.msra.mxu1 %v2660_v10  ;;  %1766 = vmatpush.bf16.msrb.mxu0 %v2640_v31  ;;  %v2955_v10 = vld [vmem:[%s3997_s16 + $0x70] sm:$0xff] }
 0x77f   : > { %1737 = vmatpush.bf16.msrb.mxu2 %v2648_v12  ;;  %v2972_v12 = vld [vmem:[%s3997_s16 + $0xf8] sm:$0xff]  ;;  %v2967_v31 = vld [vmem:[%s3997_s16 + $0xd0] sm:$0xff] }
 0x780   : > { %2138 = vmatpush.bf16.msrb.mxu3 %v2956_v16 }
 0x782   : > { %1780 = vmatpush.bf16.msra.mxu1 %v2644_v36  ;;  %1767 = vmatpush.bf16.msrb.mxu0 %v2624_v45  ;;  %s3996_s2 = scalar_lea.vmem %s3995_s19, %s3513_s10  ;;  %v3839_v36 = vld [vmem:[%s3552_s17] sm:$0xf] }
 0x783   : > { %1738 = vmatpush.bf16.msrb.mxu2 %v2632_v24  ;;  %v3102_v62 = vld [vmem:[%s3996_s2] ss:$0 sm:$0xff]  ;;  %v2954_v24 = vld [vmem:[%s3997_s16 + $0x68] sm:$0xff]  ;;  %v1566_v40 = vperm.slane %v3839_v36, 2  ;;  %v1567_v41 = vperm.slane %v3839_v36, 3 }
 0x784   : > { %2139 = vmatpush.bf16.msrb.mxu3 %v2955_v10 }
 0x786   : > { %1781 = vmatpush.bf16.msra.mxu1 %v2628_v47 }
 0x787   : > { %1739 = vmatpush.bf16.msrb.mxu2 %v2616_v29  ;;  %v2965_v29 = vld [vmem:[%s3997_s16 + $0xc0] sm:$0xff] }
 0x788   : > { %2140 = vmatpush.bf16.msrb.mxu3 %v2954_v24 }
 0x78a   : > { %2166 = vmatpush.bf16.msrb.mxu1 %v2972_v12 }
 0x78b   : > { %2124 = vmatpush.bf16.msra.mxu2 %v2948_v15 }
 0x78e   : > { %2167 = vmatpush.bf16.msrb.mxu1 %v2971_v14 }
 0x78f   : > { %2125 = vmatpush.bf16.msra.mxu2 %v2947_v19 }
 0x792   : > { %2168 = vmatpush.bf16.msrb.mxu1 %v2970_v18 }
 0x793   : > { %2126 = vmatpush.bf16.msra.mxu2 %v2946_v23 }
 0x796   : > { %2169 = vmatpush.bf16.msrb.mxu1 %v2969_v22 }
 0x797   : > { %2127 = vmatpush.bf16.msra.mxu2 %v2945_v27 }
 0x79a   : > { %2170 = vmatpush.bf16.msrb.mxu1 %v2968_v26 }
 0x79b   : > { %2128 = vmatpush.bf16.msra.mxu2 %v2944_v32 }
 0x79e   : > { %2171 = vmatpush.bf16.msrb.mxu1 %v2967_v31 }
 0x79f   : > { %2129 = vmatpush.bf16.msra.mxu2 %v2943_v37 }
 0x7a3   : > { %2130 = vmatpush.bf16.msra.mxu2 %v2942_v42 }
 0x7e7   : > { %v1490_v28 = vpop.xlane.xlu2 %1489 }
 0x7e8   : > { %v1493_v35 = vmul.f32 %v1490_v28, %v3718_v63  ;;  %v2953_v28 = vld [vmem:[%s3997_s16 + $0x60] sm:$0xff] }
 0x7e9   : > { %2141 = vmatpush.bf16.msrb.mxu3 %v2953_v28 }
 0x7ea   : > { %v1495_v44 = vadd.f32 1e-12, %v1493_v35  ;;  %v2966_v35 = vld [vmem:[%s3997_s16 + $0xc8] sm:$0xff] }
 0x7eb   : > { %2172 = vmatpush.bf16.msrb.mxu1 %v2966_v35 }
 0x7ec   : > { %3141 = vrsqrt.f32 %v1495_v44  ;;  %vm1503_vm14 = vweird.f32 %v1495_v44 }
 0x7ed   : > { %2142 = vmatpush.bf16.msrb.mxu3 %v2952_v33 }
 0x7ef   : > { %v1492_v48 = vpop.xlane.xlu0 %1491  ;;  %2173 = vmatpush.bf16.msrb.mxu1 %v2965_v29 }
 0x7f0   : > { %v1494_v49 = vmul.f32 %v1492_v48, %v3718_v63  ;;  %v1564_v48 = vperm.slane %v3839_v36, 0 }
 0x7f1   : > { %2143 = vmatpush.bf16.msrb.mxu3 %v2951_v38 }
 0x7f2   : > { %v3142_v2 = vpop.eup %3141  ;;  %v1496_v1 = vadd.f32 1e-12, %v1494_v49  ;;  %v1565_v49 = vperm.slane %v3839_v36, 1 }
 0x7f3   : > { %v1498_v50 = vmul.f32 %v3142_v2, %v1495_v44  ;;  %vm1504_vm13 = vweird.f32 %v3142_v2 }
 0x7f4   : > { %3143 = vrsqrt.f32 %v1496_v1  ;;  %vm1505_vm15 = vmor %vm1503_vm14, %vm1504_vm13  ;;  %vm1513_vm1 = vweird.f32 %v1496_v1 }
 0x7f5   : > { %v1499_v51 = vmul.f32 %v3142_v2, %v1498_v50  ;;  %2144 = vmatpush.bf16.msrb.mxu3 %v2950_v43  ;;  %v2941_v50 = vld [vmem:[%s3997_s16] sm:$0xff] }
 0x7f6   : > { %2131 = vmatpush.bf16.msra.mxu2 %v2941_v50 }
 0x7f7   : > { %v1500_v52 = vmul.f32 0.5, %v1499_v51  ;;  %v2949_v51 = vld [vmem:[%s3997_s16 + $0x40] sm:$0xff] }
 0x7f9   : > { %v1501_v53 = vsub.f32 1.5, %v1500_v52  ;;  %2145 = vmatpush.bf16.msrb.mxu3 %v2949_v51 }
 0x7fa   : > { %v3144_v54 = vpop.eup %3143 }
 0x7fb   : > { %v1502_v55 = vmul.f32 %v3142_v2, %v1501_v53  ;;  %v1508_v56 = vmul.f32 %v3144_v54, %v1496_v1  ;;  %vm1514_vm0 = vweird.f32 %v3144_v54 }
 0x7fc   : > { %vm1515_vm2 = vmor %vm1513_vm1, %vm1514_vm0 }
 0x7fd   : > { %v1509_v57 = vmul.f32 %v3144_v54, %v1508_v56  ;;  %v1506_v58 = vsel %vm1505_vm15, %v3142_v2, %v1502_v55 }
 0x7fe   : > { %v1517_v61 = vmul.f32 %v1506_v58, %v3721_v21  ;;  %v3103_v21 = vld [vmem:[%s3999_s26] ss:$0 sm:$0xff] }
 0x7ff   : > { %v1510_v59 = vmul.f32 0.5, %v1509_v57 }
 0x800   : > { %v1522_v5 = vmul.f32 %v3102_v62, %v1517_v61 }
 0x801   : > { %v1511_v60 = vsub.f32 1.5, %v1510_v59 }
 0x802   : > { %v3808_v8 = vadd.f32 %v3103_v21, %v1522_v5 }
 0x803   : > { %v1512_v0 = vmul.f32 %v3144_v54, %v1511_v60 }
 0x805   : > { %v1516_v3 = vsel %vm1515_vm2, %v3144_v54, %v1512_v0 }
 0x806   : > { %v1518_v4 = vmul.f32 %v1516_v3, %v3726_v7  ;;  %v2964_v7 = vld [vmem:[%s3997_s16 + $0xb8] sm:$0xff] }
 0x807   : > { %2152 = vmatpush.bf16.msra.mxu0 %v2964_v7 }
 0x808   : > { %v1523_v6 = vmul.f32 %v3102_v62, %v1518_v4 }
 0x80a   : > { %v3810_v9 = vadd.f32 %v3103_v21, %v1523_v6 }
 0x80b   : > { %2153 = vmatpush.bf16.msra.mxu0 %v2963_v13 }
 0x80c   : > { %v1529_v11 = vpack.c.bf16 %v3810_v9, %v3808_v8 }
 0x80e   : > { %1740 = vmatmul.bf16.vlgmr.msrb.gmra.mxu2 %v1529_v11  ;;  %1754 = vmatmul.bf16.vlgmr.msra.gmra.mxu3 %v1529_v11 }
 0x80f   : > { %1768 = vmatmul.bf16.vlgmr.msrb.gmra.mxu0 %v1529_v11  ;;  %1782 = vmatmul.bf16.vlgmr.msra.gmra.mxu1 %v1529_v11 }
 0x810   : > { %2154 = vmatpush.bf16.msra.mxu0 %v2962_v17 }
 0x814   : > { %2155 = vmatpush.bf16.msra.mxu0 %v2961_v20 }
 0x818   : > { %2156 = vmatpush.bf16.msra.mxu0 %v2960_v25 }
 0x81c   : > { %2157 = vmatpush.bf16.msra.mxu0 %v2959_v30 }
 0x820   : > { %2158 = vmatpush.bf16.msra.mxu0 %v2958_v34 }
 0x824   : > { %2159 = vmatpush.bf16.msra.mxu0 %v2957_v39 }
 0x88c   : > { %v1769_v44 = vpop.f32.mrf.mxu0  ;;  %v1783_v45 = vpop.f32.mrf.mxu1 }
 0x88d   : > { %v3849_v46 = vadd.f32 %v1769_v44, %v1566_v40  ;;  %v3851_v47 = vadd.f32 %v1783_v45, %v1567_v41 }
 0x88f   : > { %v1798_v2 = vmul.f32 0.044715, %v3849_v46  ;;  %v1799_v1 = vmul.f32 0.044715, %v3851_v47  ;;  %v1790_v50 = vmul.f32 0.5, %v3849_v46 }
 0x891   : > { %v1806_v52 = vmul.f32 %v1798_v2, %v3849_v46  ;;  %v1807_v53 = vmul.f32 %v1799_v1, %v3851_v47  ;;  %v1741_v54 = vpop.f32.mrf.mxu2  ;;  %v1755_v55 = vpop.f32.mrf.mxu3 }
 0x892   : > { %v3861_v56 = vadd.f32 %v1741_v54, %v1564_v48  ;;  %v3863_v57 = vadd.f32 %v1755_v55, %v1565_v49  ;;  %v1791_v54 = vmul.f32 0.5, %v3851_v47 }
 0x893   : > { %v1814_v58 = vmul.f32 %v1806_v52, %v3849_v46  ;;  %v1815_v59 = vmul.f32 %v1807_v53, %v3851_v47 }
 0x894   : > { %v1796_v60 = vmul.f32 0.044715, %v3861_v56  ;;  %v1797_v61 = vmul.f32 0.044715, %v3863_v57  ;;  %v1771_v62 = vpop.f32.mrf.mxu0  ;;  %v1785_v0 = vpop.f32.mrf.mxu1 }
 0x895   : > { %v1822_v3 = vadd.f32 %v1814_v58, %v3849_v46  ;;  %v1772_v4 = vadd.f32 %v1771_v62, %v1566_v40  ;;  %v1786_v5 = vadd.f32 %v1785_v0, %v1567_v41  ;;  %v1823_v21 = vadd.f32 %v1815_v59, %v3851_v47 }
 0x896   : > { %v1804_v6 = vmul.f32 %v1796_v60, %v3861_v56  ;;  %v1805_v11 = vmul.f32 %v1797_v61, %v3863_v57  ;;  %v1789_v47 = vmul.f32 0.5, %v3863_v57 }
 0x897   : > { %v1802_v7 = vmul.f32 0.044715, %v1772_v4  ;;  %v1803_v14 = vmul.f32 0.044715, %v1786_v5  ;;  %v1830_v15 = vmul.f32 0.7978846, %v1822_v3 }
 0x898   : > { %v1812_v12 = vmul.f32 %v1804_v6, %v3861_v56  ;;  %v1813_v13 = vmul.f32 %v1805_v11, %v3863_v57  ;;  %v1831_v19 = vmul.f32 0.7978846, %v1823_v21  ;;  %v1794_v51 = vmul.f32 0.5, %v1772_v4 }
 0x899   : > { %v1810_v16 = vmul.f32 %v1802_v7, %v1772_v4  ;;  %v1743_v17 = vpop.f32.mrf.mxu2  ;;  %v1757_v18 = vpop.f32.mrf.mxu3  ;;  %v1811_v20 = vmul.f32 %v1803_v14, %v1786_v5  ;;  %3145 = vtanh.f32 %v1830_v15  ;;  %v1795_v55 = vmul.f32 0.5, %v1786_v5 }
 0x89a   : > { %v1820_v10 = vadd.f32 %v1812_v12, %v3861_v56  ;;  %v1744_v22 = vadd.f32 %v1743_v17, %v1564_v48  ;;  %v1821_v23 = vadd.f32 %v1813_v13, %v3863_v57  ;;  %v1758_v25 = vadd.f32 %v1757_v18, %v1565_v49 }
 0x89b   : > { %v1818_v24 = vmul.f32 %v1810_v16, %v1772_v4  ;;  %v1819_v27 = vmul.f32 %v1811_v20, %v1786_v5  ;;  %3147 = vtanh.f32 %v1831_v19  ;;  %v1788_v12 = vmul.f32 0.5, %v3861_v56  ;;  %v3104_v56 = vld [vmem:[%s746_s4] ss:$0 sm:$0xff] }
 0x89c   : > { %v1828_v26 = vmul.f32 0.7978846, %v1820_v10  ;;  %v1800_v28 = vmul.f32 0.044715, %v1744_v22  ;;  %v1801_v31 = vmul.f32 0.044715, %v1758_v25 }
 0x89d   : > { %v1826_v30 = vadd.f32 %v1818_v24, %v1772_v4  ;;  %v1827_v32 = vadd.f32 %v1819_v27, %v1786_v5  ;;  %v1829_v34 = vmul.f32 0.7978846, %v1821_v23  ;;  %v1792_v46 = vmul.f32 0.5, %v1744_v22 }
 0x89e   : > { %v1808_v33 = vmul.f32 %v1800_v28, %v1744_v22  ;;  %v1809_v36 = vmul.f32 %v1801_v31, %v1758_v25  ;;  %3149 = vtanh.f32 %v1828_v26  ;;  %v1793_v5 = vmul.f32 0.5, %v1758_v25 }
 0x89f   : > { %v1834_v35 = vmul.f32 0.7978846, %v1826_v30  ;;  %v1835_v37 = vmul.f32 0.7978846, %v1827_v32  ;;  %v3146_v40 = vpop.eup %3145 }
 0x8a0   : > { %v1816_v38 = vmul.f32 %v1808_v33, %v1744_v22  ;;  %v1817_v39 = vmul.f32 %v1809_v36, %v1758_v25  ;;  %v1846_v48 = vadd.f32 1.0, %v3146_v40 }
 0x8a1   : > { %3151 = vtanh.f32 %v1834_v35  ;;  %v3148_v42 = vpop.eup %3147 }
 0x8a2   : > { %v1824_v29 = vadd.f32 %v1816_v38, %v1744_v22  ;;  %3153 = vtanh.f32 %v1835_v37  ;;  %v1825_v41 = vadd.f32 %v1817_v39, %v1758_v25  ;;  %v1847_v2 = vadd.f32 1.0, %v3148_v42 }
 0x8a3   : > { %3155 = vtanh.f32 %v1829_v34  ;;  %v1854_v59 = vmul.f32 %v1846_v48, %v1790_v50 }
 0x8a4   : > { %v1832_v43 = vmul.f32 0.7978846, %v1824_v29  ;;  %v1833_v44 = vmul.f32 0.7978846, %v1825_v41  ;;  %v3150_v45 = vpop.eup %3149  ;;  %v1855_v61 = vmul.f32 %v1847_v2, %v1791_v54 }
 0x8a5   : > { %v1844_v0 = vadd.f32 1.0, %v3150_v45 }
 0x8a6   : > { %3157 = vtanh.f32 %v1832_v43 }
 0x8a7   : > { %v3152_v49 = vpop.eup %3151  ;;  %3159 = vtanh.f32 %v1833_v44  ;;  %v1852_v14 = vmul.f32 %v1844_v0, %v1788_v12 }
 0x8a8   : > { %v3154_v1 = vpop.eup %3153  ;;  %v1850_v52 = vadd.f32 1.0, %v3152_v49 }
 0x8a9   : > { %v3156_v53 = vpop.eup %3155  ;;  %v1851_v58 = vadd.f32 1.0, %v3154_v1 }
 0x8aa   : > { %v1858_v60 = vmul.f32 %v1850_v52, %v1794_v51  ;;  %v1845_v6 = vadd.f32 1.0, %v3156_v53 }
 0x8ab   : > { %v1859_v62 = vmul.f32 %v1851_v58, %v1795_v55 }
 0x8ac   : > { %v3158_v3 = vpop.eup %3157  ;;  %v1862_v21 = vpack.c.bf16 %v1858_v60, %v1854_v59  ;;  %v1853_v16 = vmul.f32 %v1845_v6, %v1789_v47  ;;  %v3106_v6 = vld [vmem:[%s752_s8] ss:$0 sm:$0xff] }
 0x8ad   : > { %v3160_v11 = vpop.eup %3159  ;;  %v1863_v7 = vpack.c.bf16 %v1859_v62, %v1855_v61  ;;  %v1848_v4 = vadd.f32 1.0, %v3158_v3  ;;  %v3105_v62 = vld [vmem:[%s749_s24] ss:$0 sm:$0xff] }
 0x8ae   : > { %2160 = vmatmul.bf16.vlgmr.msra.gmra.mxu0 %v1862_v21  ;;  %v1849_v13 = vadd.f32 1.0, %v3160_v11 }
 0x8af   : > { %2174 = vmatmul.bf16.vlgmr.msrb.gmra.mxu1 %v1863_v7  ;;  %v1856_v15 = vmul.f32 %v1848_v4, %v1792_v46 }
 0x8b0   : > { %v1857_v17 = vmul.f32 %v1849_v13, %v1793_v5 }
 0x8b1   : > { %v1860_v18 = vpack.c.bf16 %v1856_v15, %v1852_v14 }
 0x8b2   : > { %v1861_v19 = vpack.c.bf16 %v1857_v17, %v1853_v16 }
 0x8b3   : > { %2132 = vmatmul.bf16.vlgmr.msra.gmra.mxu2 %v1860_v18 }
 0x8b4   : > { %2146 = vmatmul.bf16.vlgmr.msrb.gmra.mxu3 %v1861_v19 }
 0x92b   : > { %v2161_v57 = vpop.f32.mrf.mxu0 }
 0x92c   : > { %v2175_v24 = vpop.f32.mrf.mxu1 }
 0x933   : > { %v2163_v33 = vpop.f32.mrf.mxu0 }
 0x934   : > { %v2177_v35 = vpop.f32.mrf.mxu1 }
 0x936   : > { %v2133_v10 = vpop.f32.mrf.mxu2 }
 0x937   : > { %v2134_v20 = vadd.f32 %v3104_v56, %v2133_v10  ;;  %v2147_v22 = vpop.f32.mrf.mxu3 }
 0x939   : > { %v2148_v23 = vadd.f32 %v2147_v22, %v2134_v20 }
 0x93b   : > { %v2162_v25 = vadd.f32 %v2161_v57, %v2148_v23 }
 0x93d   : > { %v2176_v26 = vadd.f32 %v2175_v24, %v2162_v25 }
 0x93e   : > { %v2135_v27 = vpop.f32.mrf.mxu2 }
 0x93f   : > { %v2136_v28 = vadd.f32 %v3104_v56, %v2135_v27  ;;  %v2180_v30 = vadd.f32 %v2176_v26, %v3808_v8  ;;  %v2149_v31 = vpop.f32.mrf.mxu3 }
 0x941   : > { %v2150_v32 = vadd.f32 %v2149_v31, %v2136_v28  ;;  %2184 = vadd.xlane.f32.xlu1 %v2180_v30 }
 0x943   : > { %v2164_v34 = vadd.f32 %v2163_v33, %v2150_v32 }
 0x945   : > { %v2178_v36 = vadd.f32 %v2177_v35, %v2164_v34 }
 0x947   : > { %v2181_v37 = vadd.f32 %v2178_v36, %v3810_v9 }
 0x949   : > { %2186 = vadd.xlane.f32.xlu2 %v2181_v37 }
 0x9b4   : > { %v2185_v38 = vpop.xlane.xlu1 %2184 }
 0x9b5   : > { %v2188_v39 = vmul.f32 %v2185_v38, %v3718_v63 }
 0x9b7   : > { %v2190_v29 = vsub.f32 %v2180_v30, %v2188_v39 }
 0x9b9   : > { %v2192_v40 = vmul.f32 %v2190_v29, %v2190_v29 }
 0x9bb   : > { %2194 = vadd.xlane.f32.xlu0 %v2192_v40 }
 0x9bc   : > { %v2187_v41 = vpop.xlane.xlu2 %2186 }
 0x9bd   : > { %v2189_v42 = vmul.f32 %v2187_v41, %v3718_v63 }
 0x9bf   : > { %v2191_v8 = vsub.f32 %v2181_v37, %v2189_v42 }
 0x9c1   : > { %v2193_v43 = vmul.f32 %v2191_v8, %v2191_v8 }
 0x9c3   : > { %2196 = vadd.xlane.f32.xlu1 %v2193_v43 }
 0xa2e   : > { %v2195_v44 = vpop.xlane.xlu0 %2194 }
 0xa2f   : > { %v2198_v45 = vmul.f32 %v2195_v44, %v3718_v63 }
 0xa31   : > { %v2200_v48 = vadd.f32 1e-12, %v2198_v45 }
 0xa33   : > { %3161 = vrsqrt.f32 %v2200_v48  ;;  %vm2208_vm4 = vweird.f32 %v2200_v48 }
 0xa36   : > { %v2197_v49 = vpop.xlane.xlu1 %2196 }
 0xa37   : > { %v2199_v9 = vmul.f32 %v2197_v49, %v3718_v63 }
 0xa39   : > { %v3162_v2 = vpop.eup %3161  ;;  %v2201_v1 = vadd.f32 1e-12, %v2199_v9 }
 0xa3a   : > { %v2203_v50 = vmul.f32 %v3162_v2, %v2200_v48  ;;  %vm2209_vm3 = vweird.f32 %v3162_v2 }
 0xa3b   : > { %3163 = vrsqrt.f32 %v2201_v1  ;;  %vm2210_vm5 = vmor %vm2208_vm4, %vm2209_vm3  ;;  %vm2218_vm7 = vweird.f32 %v2201_v1 }
 0xa3c   : > { %v2204_v51 = vmul.f32 %v3162_v2, %v2203_v50 }
 0xa3e   : > { %v2205_v52 = vmul.f32 0.5, %v2204_v51 }
 0xa40   : > { %v2206_v53 = vsub.f32 1.5, %v2205_v52 }
 0xa41   : > { %v3164_v54 = vpop.eup %3163 }
 0xa42   : > { %v2207_v55 = vmul.f32 %v3162_v2, %v2206_v53  ;;  %v2213_v58 = vmul.f32 %v3164_v54, %v2201_v1  ;;  %vm2219_vm6 = vweird.f32 %v3164_v54 }
 0xa43   : > { %vm2220_vm8 = vmor %vm2218_vm7, %vm2219_vm6 }
 0xa44   : > { %v2214_v59 = vmul.f32 %v3164_v54, %v2213_v58  ;;  %v2211_v60 = vsel %vm2210_vm5, %v3162_v2, %v2207_v55 }
 0xa45   : > { %v2222_v0 = vmul.f32 %v2211_v60, %v2190_v29 }
 0xa46   : > { %v2215_v61 = vmul.f32 0.5, %v2214_v59 }
 0xa47   : > { %v2227_v11 = vmul.f32 %v3105_v62, %v2222_v0 }
 0xa48   : > { %v2216_v63 = vsub.f32 1.5, %v2215_v61 }
 0xa49   : > { %v2232_v46 = vadd.f32 %v3106_v6, %v2227_v11 }
 0xa4a   : > { %v2217_v3 = vmul.f32 %v3164_v54, %v2216_v63 }
 0xa4c   : > { %v2221_v21 = vsel %vm2220_vm8, %v3164_v54, %v2217_v3 }
 0xa4d   : > { %v2223_v7 = vmul.f32 %v2221_v21, %v2191_v8 }
 0xa4f   : > { %v2228_v12 = vmul.f32 %v3105_v62, %v2223_v7 }
 0xa51   : > { %v2233_v4 = vadd.f32 %v3106_v6, %v2228_v12 }
 0xa53   : > { %v2985_v47 = vpack.c.bf16 %v2233_v4, %v2232_v46 }
 0xa55   : > { %2986 = vst [vmem:[%s3569_s20] sm:$0xff] %v2985_v47  }
 0xa56 PF: > { %s4003_s0 = sld [smem:[#allocation15_spill]] }
 0xa57   : > { %s4004_s25 = sld [smem:[#allocation11_spill]] }
 0xa58   : > { %s4005_s26 = sld [smem:[#allocation12_spill]] }
 0xa59   : > { %s4006_s27 = sld [smem:[#allocation18_spill]] }
 0xa5a   : > { %s4007_s28 = sld [smem:[#allocation13_spill]] }
 0xa5b   : > { %s4008_s29 = sld [smem:[#allocation14_spill]] }
 0xa5c   : > { %s40_s0 = sadd.s32 1, %s4003_s0   ;;  %s4009_s30 = sld [smem:[#allocation16_spill]] }
 0xa5d   : > { %p37_p3 = scmp.ge.s32.totalorder %s40_s0, 6   ;;  %s4010_s3 = sld [smem:[#allocation17_spill]] }
 0xa5f   :  { %39 = sbr.rel (!%p37_p3) target bundleno = 35 (0x23), region = 170 }
 0xa64   :  { %2259 = vsyncpa [#allocation5], 1 }
 0xa65   :  { %2261 = vsyncpa [#allocation5 + $0x1], 1 }
 0xa66   :  { %2262 = vsyncpa [#allocation7], 1 }
 0xa67   :  { %2264 = vsyncpa [#allocation7 + $0x1], 1 }

</bundles_post_ra>
